<compile_context>
chip_gen: v5e
topology: v5e:2x2
jax: 0.10.0
libtpu: 0.0.40
codegen_flags: <defaults>
</compile_context>

<pallas_src>
import functools
import math

import jax
import jax.numpy as jnp
import numpy as np
from jax import lax
from jax.experimental import pallas as pl
from jax.experimental.pallas import tpu as pltpu

EPS = 1e-5       # nn.BatchNorm2d default eps
GAMMA = 0.1      # cfg.gamma -> confidence_ratio

NT_DIMS = (((1,), (1,)), ((), ()))   # contract trailing dims of both operands: A @ B.T


def _sum_channel_blocks(z, n_channels, height):
    """Sum the C consecutive (H, W) row-blocks of a (C*H, W) array (C*H*W adds)."""
    acc = z[0:height, :]
    for c in range(1, n_channels):
        acc = acc + z[c * height:(c + 1) * height, :]
    return acc


# ----------------------------------- fused kernel -----------------------------------
def _union_attention_kernel(x_ref, wqkv_ref, qb_ref, wfc_ref, cpack_ref, o_ref,
                            *, n_channels, height, gamma, batches_per_step):
    C = n_channels
    H = height
    CH = C * H
    inv_hw = 1.0 / float(H * o_ref.shape[3])

    # ------- loop-invariant constants (hoisted; built from iota, no HBM constants) -------
    rr = lax.broadcasted_iota(jnp.int32, (C, C), 0)
    cc = lax.broadcasted_iota(jnp.int32, (C, C), 1)
    strict_lower = cc < rr                                    # [i, j] = (j < i): rank tie-break
    ones_c1 = jnp.full((C, 1), 1.0, jnp.float32)

    # (C, C*H) per-channel segment-sum selector (for GAP) and its (C*H, C)
    # per-channel broadcast counterpart (for expanding (C,1) coefficients to (C*H,1)).
    gr = lax.broadcasted_iota(jnp.int32, (C, CH), 0)
    gc = lax.broadcasted_iota(jnp.int32, (C, CH), 1)
    sel = jnp.where((gc >= gr * H) & (gc < (gr + 1) * H), 1.0, 0.0)       # (C, C*H)
    er = lax.broadcasted_iota(jnp.int32, (CH, C), 0)
    ec = lax.broadcasted_iota(jnp.int32, (CH, C), 1)
    expand = jnp.where((er >= ec * H) & (er < (ec + 1) * H), 1.0, 0.0)    # (C*H, C)

    # Packed per-channel constants: [bn_scale; bn_bias; Wsq; Wsk; Wsv]  (5C, 1).
    cpack = cpack_ref[...]
    bn_s = cpack[0 * C:1 * C, :]
    bn_b = cpack[1 * C:2 * C, :]
    wsq = cpack[2 * C:3 * C, :]
    wsk = cpack[3 * C:4 * C, :]
    wsv = cpack[4 * C:5 * C, :]

    wqkv = wqkv_ref[...]          # (3C, C), eval-mode `norm` affine folded in host-side
    qb = qb_ref[...]              # (3C, 1)
    wfc = wfc_ref[...]            # (C, C)

    # torch.quantile('linear') interpolation constants (static).
    pos = gamma * (C - 1)
    lo = int(math.floor(pos))
    hi = min(lo + 1, C - 1)
    frac = float(pos - lo)

    # Static unrolled loop over the batch elements packed into this grid step.
    for i in range(batches_per_step):
        zb = x_ref[i]                                                     # (C*H, W) f32

        # -------- Channel_Tracer: GAP -> (folded) norm -> channel q/k/v --------
        rowsum = jnp.sum(zb, axis=1, keepdims=True)                       # (C*H, 1)
        avg = jnp.dot(sel, rowsum, preferred_element_type=jnp.float32) * inv_hw   # (C, 1)
        # BatchNorm(eval) of the pooled vector is folded into wqkv/qb; Dropout3d is identity.
        qkv = jnp.dot(wqkv, avg, preferred_element_type=jnp.float32) + qb          # (3C, 1)
        q = qkv[0 * C:1 * C, :]
        k = qkv[1 * C:2 * C, :]
        v = qkv[2 * C:3 * C, :]

        # channel attention: softmax(q k^T) v -> fc -> sigmoid.
        scores = lax.dot_general(q, k, NT_DIMS, preferred_element_type=jnp.float32)  # (C, C)
        scores = scores - jnp.max(scores, axis=-1, keepdims=True)
        e = jnp.exp(scores)
        # Exact reciprocal here: `att` feeds the discrete quantile threshold below.
        alpha = e / jnp.sum(e, axis=-1, keepdims=True)
        attv = jnp.dot(alpha, v, preferred_element_type=jnp.float32)                 # (C, 1)
        att = jax.nn.sigmoid(
            jnp.dot(wfc, attv, preferred_element_type=jnp.float32))                  # (C, 1)

        # -------- masking(): torch.quantile(gamma, 'linear') threshold --------
        # rank_i = #{j : att_j < att_i} + #{j : att_j == att_i, j < i}  (exact 0..C-1)
        att_cols = lax.dot_general(ones_c1, att, NT_DIMS,
                                   preferred_element_type=jnp.float32)               # [i,j]=att[j]
        lt = att_cols < att
        tie = (att_cols == att) & strict_lower
        rank = jnp.sum(jnp.where(lt | tie, 1.0, 0.0), axis=1, keepdims=True)          # (C, 1)
        val_lo = jnp.sum(jnp.where(rank == float(lo), att, 0.0), axis=0, keepdims=True)
        val_hi = jnp.sum(jnp.where(rank == float(hi), att, 0.0), axis=0, keepdims=True)
        thr = val_lo + frac * (val_hi - val_lo)                                       # (1, 1)
        mask = jnp.where(att <= thr, 0.0, att)                                        # (C, 1)

        # -------- fold residual + self.bn + mask + spatial 1x1 convs --------
        # x_drop[c] = mask[c] * (bn_s[c] * (1 + att[c]) * x[c] + bn_b[c])
        #           = coef[c] * x[c] + biasv[c]
        coef = mask * bn_s * (1.0 + att)                                              # (C, 1)
        biasv = mask * bn_b                                                           # (C, 1)
        cq = jnp.dot(expand, wsq * coef, preferred_element_type=jnp.float32)          # (C*H, 1)
        ck = jnp.dot(expand, wsk * coef, preferred_element_type=jnp.float32)
        cv = jnp.dot(expand, wsv * coef, preferred_element_type=jnp.float32)
        const_q = jnp.sum(wsq * biasv, axis=0, keepdims=True)                         # (1, 1)
        const_k = jnp.sum(wsk * biasv, axis=0, keepdims=True)
        const_v = jnp.sum(wsv * biasv, axis=0, keepdims=True)

        # spatial 1x1 convs: per-channel scale then block-row sum (minimal C*H*W work).
        Qm = const_q + _sum_channel_blocks(zb * cq, C, H)                             # (H, W)
        Km = const_k + _sum_channel_blocks(zb * ck, C, H)
        Vm = const_v + _sum_channel_blocks(zb * cv, C, H)

        # -------- spatial attention: softmax(Q K^T) V + V --------
        s = lax.dot_general(Qm, Km, NT_DIMS, preferred_element_type=jnp.float32)      # (H, H)
        s = s - jnp.max(s, axis=-1, keepdims=True)
        es = jnp.exp(s)
        alpha2 = es * pl.reciprocal(jnp.sum(es, axis=-1, keepdims=True), approx=True)
        out = jnp.dot(alpha2, Vm, preferred_element_type=jnp.float32) + Vm            # (H, W)

        o_ref[i, 0] = out.astype(o_ref.dtype)


# ------------------------------------- forward wrapper ------------------------------------
def union_attention_forward(x, p, *, batches_per_step=None):
    B, C, H, W = x.shape

    if batches_per_step is None:
        # Amortize per-grid-step overhead (v5e/v6e) while keeping >= 2 grid steps so
        # both v7x TensorCores stay busy under dimension_semantics=("parallel",).
        batches_per_step = B // 2 if (B % 2 == 0 and B >= 4) else 1
    nb = batches_per_step
    assert B % nb == 0, (B, nb)

    # Fold eval-mode BatchNorm running stats into per-channel scale/bias (host-side glue).
    norm_scale = p["norm_w"] / jnp.sqrt(p["norm_rv"] + EPS)
    norm_bias = p["norm_b"] - p["norm_rm"] * norm_scale
    bn_scale = p["bn_w"] / jnp.sqrt(p["bn_rv"] + EPS)
    bn_bias = p["bn_b"] - p["bn_rm"] * bn_scale

    # Stacked channel projections with the `norm` affine folded into them:
    #   q = Wq @ (avg*ns + nbias) = (Wq * ns_row) @ avg + Wq @ nbias.
    wqkv = jnp.concatenate([p["Wq"], p["Wk"], p["Wv"]], axis=0).astype(jnp.float32)   # (3C, C)
    wqkv_folded = wqkv * norm_scale[None, :]                                          # (3C, C)
    qkv_bias = (wqkv @ norm_bias).reshape(3 * C, 1).astype(jnp.float32)               # (3C, 1)

    # Packed per-channel constants: [bn_scale; bn_bias; Wsq; Wsk; Wsv] -> (5C, 1).
    cpack = jnp.concatenate(
        [bn_scale, bn_bias, p["Wsq"], p["Wsk"], p["Wsv"]]).reshape(5 * C, 1).astype(jnp.float32)

    # NCHW is contiguous, so (B, C, H, W) -> (B, C*H, W) is a free re-view.
    x2 = x.reshape(B, C * H, W).astype(jnp.float32)

    kern = functools.partial(_union_attention_kernel, n_channels=C, height=H,
                             gamma=GAMMA, batches_per_step=nb)
    bcast = lambda b: (0, 0)
    return pl.pallas_call(
        kern,
        grid=(B // nb,),
        in_specs=[
            pl.BlockSpec((nb, C * H, W), lambda b: (b, 0, 0)),   # x[b-block] as (C*H, W)
            pl.BlockSpec((3 * C, C), bcast),                     # stacked Wq/Wk/Wv (norm folded)
            pl.BlockSpec((3 * C, 1), bcast),                     # folded norm bias
            pl.BlockSpec((C, C), bcast),                         # Wfc
            pl.BlockSpec((5 * C, 1), bcast),                     # packed bn scale/bias + Ws q/k/v
        ],
        out_specs=pl.BlockSpec((nb, 1, H, W), lambda b: (b, 0, 0, 0)),
        out_shape=jax.ShapeDtypeStruct((B, 1, H, W), jnp.float32),
        compiler_params=pltpu.CompilerParams(
            dimension_semantics=("parallel",),        # batch blocks are independent
            vmem_limit_bytes=32 * 1024 * 1024),
    )(x2, wqkv_folded, qkv_bias, p["Wfc"].astype(jnp.float32), cpack)


# ------------------------------------ reference (JAX) -------------------------------------
def reference_forward(x, p):
    B, C, H, W = x.shape
    with jax.default_matmul_precision("float32"):
        avg = x.mean(axis=(2, 3))                                              # GAP -> (B, C)
        xn = (avg - p["norm_rm"]) / jnp.sqrt(p["norm_rv"] + EPS) * p["norm_w"] + p["norm_b"]
        q = jnp.einsum("oc,bc->bo", p["Wq"], xn)
        k = jnp.einsum("oc,bc->bo", p["Wk"], xn)
        v = jnp.einsum("oc,bc->bo", p["Wv"], xn)
        qk = jnp.einsum("bi,bj->bij", q, k)
        alpha = jax.nn.softmax(qk, axis=-1)
        att = jnp.einsum("bij,bj->bi", alpha, v)
        att = jax.nn.sigmoid(jnp.einsum("oc,bc->bo", p["Wfc"], att))           # (B, C)
        xc = x * att[:, :, None, None] + x
        xc = ((xc - p["bn_rm"][None, :, None, None])
              / jnp.sqrt(p["bn_rv"] + EPS)[None, :, None, None]
              * p["bn_w"][None, :, None, None] + p["bn_b"][None, :, None, None])
        thr = jnp.quantile(att, GAMMA, axis=-1, keepdims=True)
        mask = jnp.where(att <= thr, 0.0, att)
        xd = xc * mask[:, :, None, None]
        sq = jnp.einsum("c,bchw->bhw", p["Wsq"], xd)
        sk = jnp.einsum("c,bchw->bhw", p["Wsk"], xd)
        sv = jnp.einsum("c,bchw->bhw", p["Wsv"], xd)
        qk2 = jnp.einsum("bhw,bgw->bhg", sq, sk)
        a2 = jax.nn.softmax(qk2, axis=-1)
        out = jnp.einsum("bhg,bgw->bhw", a2, sv) + sv
    return out[:, None, :, :]


# ------------------------------------- parameter init -------------------------------------
def init_params(key, C):
    ks = jax.random.split(key, 15)
    n = lambda i, shape, scale=1.0: scale * jax.random.normal(ks[i], shape, jnp.float32)
    return {
        "Wq": n(0, (C, C), 0.4),       # channel_q conv weight (C_out, C_in)
        "Wk": n(1, (C, C), 0.4),
        "Wv": n(2, (C, C), 0.4),
        "Wfc": n(3, (C, C), 0.4),
        "Wsq": n(4, (C,), 0.4),        # spatial_q conv weight (1, C, 1, 1) -> (C,)
        "Wsk": n(5, (C,), 0.4),
        "Wsv": n(6, (C,), 0.4),
        # eval-mode BatchNorm parameters / running stats (deterministic synthetic init)
        "norm_w": 1.0 + n(7, (C,), 0.1),
        "norm_b": n(8, (C,), 0.1),
        "norm_rm": n(9, (C,), 0.1),
        "norm_rv": 1.0 + 0.1 * jnp.abs(jax.random.normal(ks[10], (C,), jnp.float32)),
        "bn_w": 1.0 + n(11, (C,), 0.1),
        "bn_b": n(12, (C,), 0.1),
        "bn_rm": n(13, (C,), 0.1),
        "bn_rv": 1.0 + 0.1 * jnp.abs(jax.random.normal(ks[14], (C,), jnp.float32)),
    }


if __name__ == "__main__":
    B, C, H, W = 2, 8, 16, 16
    key = jax.random.PRNGKey(0)
    kx, kp = jax.random.split(key)
    x = jax.random.normal(kx, (B, C, H, W), dtype=jnp.float32)
    params = init_params(kp, C)

    fwd = jax.jit(union_attention_forward)
    out = jax.block_until_ready(fwd(x, params))
    assert out.shape == (B, 1, H, W), out.shape

    ref = np.asarray(reference_forward(x, params))
    got = np.asarray(out)
    # Loose-ish tolerance: MXU f32 matmuls + approx-reciprocal spatial softmax vs. XLA einsums.
    if not np.allclose(got, ref, rtol=5e-2, atol=5e-2):
        err = float(np.max(np.abs(got - ref)))
        raise AssertionError(f"Pallas output does not match reference (max abs err={err})")
    print("KERNEL_OK")
</pallas_src>

<mosaic_0001>
module attributes {stable_mosaic.version = 11 : i64} {
  func.func @_union_attention_kernel(%arg0: i32, %arg1: memref<1x128x16xf32, #tpu.memory_space<vmem>>, %arg2: memref<24x8xf32, #tpu.memory_space<vmem>>, %arg3: memref<24x1xf32, #tpu.memory_space<vmem>>, %arg4: memref<8x8xf32, #tpu.memory_space<vmem>>, %arg5: memref<40x1xf32, #tpu.memory_space<vmem>>, %arg6: memref<1x1x16x16xf32, #tpu.memory_space<vmem>>) attributes {dimension_semantics = [#tpu.dimension_semantics<parallel>], iteration_bounds = array<i64: 2>, scalar_prefetch = 0 : i64, scratch_operands = 0 : i64, tpu.core_type = #tpu.core_type<tc>, window_params = [{transform_indices = @transform_0, window_bounds = array<i64: 1, 128, 16>}, {pipeline_mode = #tpu.pipeline_mode<synchronous>, transform_indices = @transform_1, window_bounds = array<i64: 24, 8>}, {pipeline_mode = #tpu.pipeline_mode<synchronous>, transform_indices = @transform_2, window_bounds = array<i64: 24, 1>}, {pipeline_mode = #tpu.pipeline_mode<synchronous>, transform_indices = @transform_3, window_bounds = array<i64: 8, 8>}, {pipeline_mode = #tpu.pipeline_mode<synchronous>, transform_indices = @transform_4, window_bounds = array<i64: 40, 1>}, {transform_indices = @transform_5, window_bounds = array<i64: 1, 1, 16, 16>}]} {
    %0 = tpu.iota {dimensions = array<i32: 0>} : vector<8x8xi32>
    %1 = tpu.iota {dimensions = array<i32: 1>} : vector<8x8xi32>
    %2 = arith.cmpi slt, %1, %0 : vector<8x8xi32>
    %cst = arith.constant 1.000000e+00 : f32
    %3 = vector.broadcast %cst : f32 to vector<8x1xf32>
    %4 = tpu.iota {dimensions = array<i32: 0>} : vector<8x128xi32>
    %5 = tpu.iota {dimensions = array<i32: 1>} : vector<8x128xi32>
    %c16_i32 = arith.constant 16 : i32
    %6 = vector.broadcast %c16_i32 : i32 to vector<8x128xi32>
    %7 = arith.muli %4, %6 : vector<8x128xi32>
    %8 = arith.cmpi sge, %5, %7 : vector<8x128xi32>
    %c1_i32 = arith.constant 1 : i32
    %9 = vector.broadcast %c1_i32 : i32 to vector<8x128xi32>
    %10 = arith.addi %4, %9 : vector<8x128xi32>
    %c16_i32_0 = arith.constant 16 : i32
    %11 = vector.broadcast %c16_i32_0 : i32 to vector<8x128xi32>
    %12 = arith.muli %10, %11 : vector<8x128xi32>
    %13 = arith.cmpi slt, %5, %12 : vector<8x128xi32>
    %14 = arith.andi %8, %13 : vector<8x128xi1>
    %cst_1 = arith.constant 1.000000e+00 : f32
    %cst_2 = arith.constant 0.000000e+00 : f32
    %15 = vector.broadcast %cst_1 : f32 to vector<8x128xf32>
    %16 = vector.broadcast %cst_2 : f32 to vector<8x128xf32>
    %17 = arith.select %14, %15, %16 : vector<8x128xi1>, vector<8x128xf32>
    %18 = tpu.iota {dimensions = array<i32: 0>} : vector<128x8xi32>
    %19 = tpu.iota {dimensions = array<i32: 1>} : vector<128x8xi32>
    %c16_i32_3 = arith.constant 16 : i32
    %20 = vector.broadcast %c16_i32_3 : i32 to vector<128x8xi32>
    %21 = arith.muli %19, %20 : vector<128x8xi32>
    %22 = arith.cmpi sge, %18, %21 : vector<128x8xi32>
    %c1_i32_4 = arith.constant 1 : i32
    %23 = vector.broadcast %c1_i32_4 : i32 to vector<128x8xi32>
    %24 = arith.addi %19, %23 : vector<128x8xi32>
    %c16_i32_5 = arith.constant 16 : i32
    %25 = vector.broadcast %c16_i32_5 : i32 to vector<128x8xi32>
    %26 = arith.muli %24, %25 : vector<128x8xi32>
    %27 = arith.cmpi slt, %18, %26 : vector<128x8xi32>
    %28 = arith.andi %22, %27 : vector<128x8xi1>
    %cst_6 = arith.constant 1.000000e+00 : f32
    %cst_7 = arith.constant 0.000000e+00 : f32
    %29 = vector.broadcast %cst_6 : f32 to vector<128x8xf32>
    %30 = vector.broadcast %cst_7 : f32 to vector<128x8xf32>
    %31 = arith.select %28, %29, %30 : vector<128x8xi1>, vector<128x8xf32>
    %c0 = arith.constant 0 : index
    %c0_8 = arith.constant 0 : index
    %32 = vector.load %arg5[%c0, %c0_8] : memref<40x1xf32, #tpu.memory_space<vmem>>, vector<40x1xf32>
    %33 = vector.extract_strided_slice %32 {offsets = [0, 0], sizes = [8, 1], strides = [1, 1]} : vector<40x1xf32> to vector<8x1xf32>
    %34 = vector.extract_strided_slice %32 {offsets = [8, 0], sizes = [8, 1], strides = [1, 1]} : vector<40x1xf32> to vector<8x1xf32>
    %35 = vector.extract_strided_slice %32 {offsets = [16, 0], sizes = [8, 1], strides = [1, 1]} : vector<40x1xf32> to vector<8x1xf32>
    %36 = vector.extract_strided_slice %32 {offsets = [24, 0], sizes = [8, 1], strides = [1, 1]} : vector<40x1xf32> to vector<8x1xf32>
    %37 = vector.extract_strided_slice %32 {offsets = [32, 0], sizes = [8, 1], strides = [1, 1]} : vector<40x1xf32> to vector<8x1xf32>
    %c0_9 = arith.constant 0 : index
    %c0_10 = arith.constant 0 : index
    %38 = vector.load %arg2[%c0_9, %c0_10] : memref<24x8xf32, #tpu.memory_space<vmem>>, vector<24x8xf32>
    %c0_11 = arith.constant 0 : index
    %c0_12 = arith.constant 0 : index
    %39 = vector.load %arg3[%c0_11, %c0_12] : memref<24x1xf32, #tpu.memory_space<vmem>>, vector<24x1xf32>
    %c0_13 = arith.constant 0 : index
    %c0_14 = arith.constant 0 : index
    %40 = vector.load %arg4[%c0_13, %c0_14] : memref<8x8xf32, #tpu.memory_space<vmem>>, vector<8x8xf32>
    %c0_15 = arith.constant 0 : index
    %c0_16 = arith.constant 0 : index
    %c0_17 = arith.constant 0 : index
    %41 = vector.load %arg1[%c0_15, %c0_16, %c0_17] : memref<1x128x16xf32, #tpu.memory_space<vmem>>, vector<1x128x16xf32>
    %42 = vector.shape_cast %41 : vector<1x128x16xf32> to vector<128x16xf32>
    %cst_18 = arith.constant dense<0.000000e+00> : vector<128xf32>
    %43 = vector.multi_reduction <add>, %42, %cst_18 [1] : vector<128x16xf32> to vector<128xf32>
    %44 = vector.shape_cast %43 : vector<128xf32> to vector<128x1xf32>
    %cst_19 = arith.constant dense<0.000000e+00> : vector<8x1xf32>
    %45 = tpu.matmul %17, %44, %cst_19 {dimension_numbers = #tpu.dot_dimension_numbers<[1], [0], [0], [1], [0, 0, 1, 1], [], []>} : vector<8x128xf32>, vector<128x1xf32>, vector<8x1xf32> -> vector<8x1xf32>
    %cst_20 = arith.constant 3.906250e-03 : f32
    %46 = vector.broadcast %cst_20 : f32 to vector<8x1xf32>
    %47 = arith.mulf %45, %46 : vector<8x1xf32>
    %cst_21 = arith.constant dense<0.000000e+00> : vector<24x1xf32>
    %48 = tpu.matmul %38, %47, %cst_21 {dimension_numbers = #tpu.dot_dimension_numbers<[1], [0], [0], [1], [0, 0, 1, 1], [], []>} : vector<24x8xf32>, vector<8x1xf32>, vector<24x1xf32> -> vector<24x1xf32>
    %49 = arith.addf %48, %39 : vector<24x1xf32>
    %50 = vector.extract_strided_slice %49 {offsets = [0, 0], sizes = [8, 1], strides = [1, 1]} : vector<24x1xf32> to vector<8x1xf32>
    %51 = vector.extract_strided_slice %49 {offsets = [8, 0], sizes = [8, 1], strides = [1, 1]} : vector<24x1xf32> to vector<8x1xf32>
    %52 = vector.extract_strided_slice %49 {offsets = [16, 0], sizes = [8, 1], strides = [1, 1]} : vector<24x1xf32> to vector<8x1xf32>
    %cst_22 = arith.constant dense<0.000000e+00> : vector<8x8xf32>
    %53 = tpu.matmul %50, %51, %cst_22 {dimension_numbers = #tpu.dot_dimension_numbers<[1], [1], [0], [0], [0, 0, 1, 0], [], []>} : vector<8x1xf32>, vector<8x1xf32>, vector<8x8xf32> -> vector<8x8xf32>
    %cst_23 = arith.constant dense<0xFF800000> : vector<8xf32>
    %54 = vector.multi_reduction <maximumf>, %53, %cst_23 [1] : vector<8x8xf32> to vector<8xf32>
    %55 = vector.shape_cast %54 : vector<8xf32> to vector<8x1xf32>
    %56 = vector.broadcast %55 : vector<8x1xf32> to vector<8x8xf32>
    %57 = arith.subf %53, %56 : vector<8x8xf32>
    %58 = math.exp %57 : vector<8x8xf32>
    %cst_24 = arith.constant dense<0.000000e+00> : vector<8xf32>
    %59 = vector.multi_reduction <add>, %58, %cst_24 [1] : vector<8x8xf32> to vector<8xf32>
    %60 = vector.shape_cast %59 : vector<8xf32> to vector<8x1xf32>
    %61 = vector.broadcast %60 : vector<8x1xf32> to vector<8x8xf32>
    %62 = arith.divf %58, %61 : vector<8x8xf32>
    %cst_25 = arith.constant dense<0.000000e+00> : vector<8x1xf32>
    %63 = tpu.matmul %62, %52, %cst_25 {dimension_numbers = #tpu.dot_dimension_numbers<[1], [0], [0], [1], [0, 0, 1, 1], [], []>} : vector<8x8xf32>, vector<8x1xf32>, vector<8x1xf32> -> vector<8x1xf32>
    %cst_26 = arith.constant dense<0.000000e+00> : vector<8x1xf32>
    %64 = tpu.matmul %40, %63, %cst_26 {dimension_numbers = #tpu.dot_dimension_numbers<[1], [0], [0], [1], [0, 0, 1, 1], [], []>} : vector<8x8xf32>, vector<8x1xf32>, vector<8x1xf32> -> vector<8x1xf32>
    %65 = arith.negf %64 : vector<8x1xf32>
    %66 = math.exp %65 : vector<8x1xf32>
    %cst_27 = arith.constant 1.000000e+00 : f32
    %67 = vector.broadcast %cst_27 : f32 to vector<8x1xf32>
    %68 = arith.addf %67, %66 : vector<8x1xf32>
    %69 = arith.divf %67, %68 : vector<8x1xf32>
    %cst_28 = arith.constant dense<0.000000e+00> : vector<8x8xf32>
    %70 = tpu.matmul %3, %69, %cst_28 {dimension_numbers = #tpu.dot_dimension_numbers<[1], [1], [0], [0], [0, 0, 1, 0], [], []>} : vector<8x1xf32>, vector<8x1xf32>, vector<8x8xf32> -> vector<8x8xf32>
    %71 = vector.broadcast %69 : vector<8x1xf32> to vector<8x8xf32>
    %72 = arith.cmpf olt, %70, %71 : vector<8x8xf32>
    %73 = vector.broadcast %69 : vector<8x1xf32> to vector<8x8xf32>
    %74 = arith.cmpf oeq, %70, %73 : vector<8x8xf32>
    %75 = arith.andi %74, %2 : vector<8x8xi1>
    %76 = arith.ori %72, %75 : vector<8x8xi1>
    %cst_29 = arith.constant 1.000000e+00 : f32
    %cst_30 = arith.constant 0.000000e+00 : f32
    %77 = vector.broadcast %cst_29 : f32 to vector<8x8xf32>
    %78 = vector.broadcast %cst_30 : f32 to vector<8x8xf32>
    %79 = arith.select %76, %77, %78 : vector<8x8xi1>, vector<8x8xf32>
    %cst_31 = arith.constant dense<0.000000e+00> : vector<8xf32>
    %80 = vector.multi_reduction <add>, %79, %cst_31 [1] : vector<8x8xf32> to vector<8xf32>
    %81 = vector.shape_cast %80 : vector<8xf32> to vector<8x1xf32>
    %cst_32 = arith.constant 0.000000e+00 : f32
    %82 = vector.broadcast %cst_32 : f32 to vector<8x1xf32>
    %83 = arith.cmpf oeq, %81, %82 : vector<8x1xf32>
    %cst_33 = arith.constant 0.000000e+00 : f32
    %84 = vector.broadcast %cst_33 : f32 to vector<8x1xf32>
    %85 = arith.select %83, %69, %84 : vector<8x1xi1>, vector<8x1xf32>
    %cst_34 = arith.constant dense<0.000000e+00> : vector<1xf32>
    %86 = vector.multi_reduction <add>, %85, %cst_34 [0] : vector<8x1xf32> to vector<1xf32>
    %87 = vector.shape_cast %86 : vector<1xf32> to vector<1x1xf32>
    %cst_35 = arith.constant 1.000000e+00 : f32
    %88 = vector.broadcast %cst_35 : f32 to vector<8x1xf32>
    %89 = arith.cmpf oeq, %81, %88 : vector<8x1xf32>
    %cst_36 = arith.constant 0.000000e+00 : f32
    %90 = vector.broadcast %cst_36 : f32 to vector<8x1xf32>
    %91 = arith.select %89, %69, %90 : vector<8x1xi1>, vector<8x1xf32>
    %cst_37 = arith.constant dense<0.000000e+00> : vector<1xf32>
    %92 = vector.multi_reduction <add>, %91, %cst_37 [0] : vector<8x1xf32> to vector<1xf32>
    %93 = vector.shape_cast %92 : vector<1xf32> to vector<1x1xf32>
    %94 = arith.subf %93, %87 : vector<1x1xf32>
    %cst_38 = arith.constant 0.699999988 : f32
    %95 = vector.broadcast %cst_38 : f32 to vector<1x1xf32>
    %96 = arith.mulf %95, %94 : vector<1x1xf32>
    %97 = arith.addf %87, %96 : vector<1x1xf32>
    %98 = vector.broadcast %97 : vector<1x1xf32> to vector<8x1xf32>
    %99 = arith.cmpf ole, %69, %98 : vector<8x1xf32>
    %cst_39 = arith.constant 0.000000e+00 : f32
    %100 = vector.broadcast %cst_39 : f32 to vector<8x1xf32>
    %101 = arith.select %99, %100, %69 : vector<8x1xi1>, vector<8x1xf32>
    %102 = arith.mulf %101, %33 : vector<8x1xf32>
    %cst_40 = arith.constant 1.000000e+00 : f32
    %103 = vector.broadcast %cst_40 : f32 to vector<8x1xf32>
    %104 = arith.addf %103, %69 : vector<8x1xf32>
    %105 = arith.mulf %102, %104 : vector<8x1xf32>
    %106 = arith.mulf %101, %34 : vector<8x1xf32>
    %107 = arith.mulf %35, %105 : vector<8x1xf32>
    %cst_41 = arith.constant dense<0.000000e+00> : vector<128x1xf32>
    %108 = tpu.matmul %31, %107, %cst_41 {dimension_numbers = #tpu.dot_dimension_numbers<[1], [0], [0], [1], [0, 0, 1, 1], [], []>} : vector<128x8xf32>, vector<8x1xf32>, vector<128x1xf32> -> vector<128x1xf32>
    %109 = arith.mulf %36, %105 : vector<8x1xf32>
    %cst_42 = arith.constant dense<0.000000e+00> : vector<128x1xf32>
    %110 = tpu.matmul %31, %109, %cst_42 {dimension_numbers = #tpu.dot_dimension_numbers<[1], [0], [0], [1], [0, 0, 1, 1], [], []>} : vector<128x8xf32>, vector<8x1xf32>, vector<128x1xf32> -> vector<128x1xf32>
    %111 = arith.mulf %37, %105 : vector<8x1xf32>
    %cst_43 = arith.constant dense<0.000000e+00> : vector<128x1xf32>
    %112 = tpu.matmul %31, %111, %cst_43 {dimension_numbers = #tpu.dot_dimension_numbers<[1], [0], [0], [1], [0, 0, 1, 1], [], []>} : vector<128x8xf32>, vector<8x1xf32>, vector<128x1xf32> -> vector<128x1xf32>
    %113 = arith.mulf %35, %106 : vector<8x1xf32>
    %cst_44 = arith.constant dense<0.000000e+00> : vector<1xf32>
    %114 = vector.multi_reduction <add>, %113, %cst_44 [0] : vector<8x1xf32> to vector<1xf32>
    %115 = vector.shape_cast %114 : vector<1xf32> to vector<1x1xf32>
    %116 = arith.mulf %36, %106 : vector<8x1xf32>
    %cst_45 = arith.constant dense<0.000000e+00> : vector<1xf32>
    %117 = vector.multi_reduction <add>, %116, %cst_45 [0] : vector<8x1xf32> to vector<1xf32>
    %118 = vector.shape_cast %117 : vector<1xf32> to vector<1x1xf32>
    %119 = arith.mulf %37, %106 : vector<8x1xf32>
    %cst_46 = arith.constant dense<0.000000e+00> : vector<1xf32>
    %120 = vector.multi_reduction <add>, %119, %cst_46 [0] : vector<8x1xf32> to vector<1xf32>
    %121 = vector.shape_cast %120 : vector<1xf32> to vector<1x1xf32>
    %122 = vector.broadcast %108 : vector<128x1xf32> to vector<128x16xf32>
    %123 = arith.mulf %42, %122 : vector<128x16xf32>
    %124 = vector.extract_strided_slice %123 {offsets = [0, 0], sizes = [16, 16], strides = [1, 1]} : vector<128x16xf32> to vector<16x16xf32>
    %125 = vector.extract_strided_slice %123 {offsets = [16, 0], sizes = [16, 16], strides = [1, 1]} : vector<128x16xf32> to vector<16x16xf32>
    %126 = arith.addf %124, %125 : vector<16x16xf32>
    %127 = vector.extract_strided_slice %123 {offsets = [32, 0], sizes = [16, 16], strides = [1, 1]} : vector<128x16xf32> to vector<16x16xf32>
    %128 = arith.addf %126, %127 : vector<16x16xf32>
    %129 = vector.extract_strided_slice %123 {offsets = [48, 0], sizes = [16, 16], strides = [1, 1]} : vector<128x16xf32> to vector<16x16xf32>
    %130 = arith.addf %128, %129 : vector<16x16xf32>
    %131 = vector.extract_strided_slice %123 {offsets = [64, 0], sizes = [16, 16], strides = [1, 1]} : vector<128x16xf32> to vector<16x16xf32>
    %132 = arith.addf %130, %131 : vector<16x16xf32>
    %133 = vector.extract_strided_slice %123 {offsets = [80, 0], sizes = [16, 16], strides = [1, 1]} : vector<128x16xf32> to vector<16x16xf32>
    %134 = arith.addf %132, %133 : vector<16x16xf32>
    %135 = vector.extract_strided_slice %123 {offsets = [96, 0], sizes = [16, 16], strides = [1, 1]} : vector<128x16xf32> to vector<16x16xf32>
    %136 = arith.addf %134, %135 : vector<16x16xf32>
    %137 = vector.extract_strided_slice %123 {offsets = [112, 0], sizes = [16, 16], strides = [1, 1]} : vector<128x16xf32> to vector<16x16xf32>
    %138 = arith.addf %136, %137 : vector<16x16xf32>
    %139 = vector.broadcast %115 : vector<1x1xf32> to vector<16x16xf32>
    %140 = arith.addf %139, %138 : vector<16x16xf32>
    %141 = vector.broadcast %110 : vector<128x1xf32> to vector<128x16xf32>
    %142 = arith.mulf %42, %141 : vector<128x16xf32>
    %143 = vector.extract_strided_slice %142 {offsets = [0, 0], sizes = [16, 16], strides = [1, 1]} : vector<128x16xf32> to vector<16x16xf32>
    %144 = vector.extract_strided_slice %142 {offsets = [16, 0], sizes = [16, 16], strides = [1, 1]} : vector<128x16xf32> to vector<16x16xf32>
    %145 = arith.addf %143, %144 : vector<16x16xf32>
    %146 = vector.extract_strided_slice %142 {offsets = [32, 0], sizes = [16, 16], strides = [1, 1]} : vector<128x16xf32> to vector<16x16xf32>
    %147 = arith.addf %145, %146 : vector<16x16xf32>
    %148 = vector.extract_strided_slice %142 {offsets = [48, 0], sizes = [16, 16], strides = [1, 1]} : vector<128x16xf32> to vector<16x16xf32>
    %149 = arith.addf %147, %148 : vector<16x16xf32>
    %150 = vector.extract_strided_slice %142 {offsets = [64, 0], sizes = [16, 16], strides = [1, 1]} : vector<128x16xf32> to vector<16x16xf32>
    %151 = arith.addf %149, %150 : vector<16x16xf32>
    %152 = vector.extract_strided_slice %142 {offsets = [80, 0], sizes = [16, 16], strides = [1, 1]} : vector<128x16xf32> to vector<16x16xf32>
    %153 = arith.addf %151, %152 : vector<16x16xf32>
    %154 = vector.extract_strided_slice %142 {offsets = [96, 0], sizes = [16, 16], strides = [1, 1]} : vector<128x16xf32> to vector<16x16xf32>
    %155 = arith.addf %153, %154 : vector<16x16xf32>
    %156 = vector.extract_strided_slice %142 {offsets = [112, 0], sizes = [16, 16], strides = [1, 1]} : vector<128x16xf32> to vector<16x16xf32>
    %157 = arith.addf %155, %156 : vector<16x16xf32>
    %158 = vector.broadcast %118 : vector<1x1xf32> to vector<16x16xf32>
    %159 = arith.addf %158, %157 : vector<16x16xf32>
    %160 = vector.broadcast %112 : vector<128x1xf32> to vector<128x16xf32>
    %161 = arith.mulf %42, %160 : vector<128x16xf32>
    %162 = vector.extract_strided_slice %161 {offsets = [0, 0], sizes = [16, 16], strides = [1, 1]} : vector<128x16xf32> to vector<16x16xf32>
    %163 = vector.extract_strided_slice %161 {offsets = [16, 0], sizes = [16, 16], strides = [1, 1]} : vector<128x16xf32> to vector<16x16xf32>
    %164 = arith.addf %162, %163 : vector<16x16xf32>
    %165 = vector.extract_strided_slice %161 {offsets = [32, 0], sizes = [16, 16], strides = [1, 1]} : vector<128x16xf32> to vector<16x16xf32>
    %166 = arith.addf %164, %165 : vector<16x16xf32>
    %167 = vector.extract_strided_slice %161 {offsets = [48, 0], sizes = [16, 16], strides = [1, 1]} : vector<128x16xf32> to vector<16x16xf32>
    %168 = arith.addf %166, %167 : vector<16x16xf32>
    %169 = vector.extract_strided_slice %161 {offsets = [64, 0], sizes = [16, 16], strides = [1, 1]} : vector<128x16xf32> to vector<16x16xf32>
    %170 = arith.addf %168, %169 : vector<16x16xf32>
    %171 = vector.extract_strided_slice %161 {offsets = [80, 0], sizes = [16, 16], strides = [1, 1]} : vector<128x16xf32> to vector<16x16xf32>
    %172 = arith.addf %170, %171 : vector<16x16xf32>
    %173 = vector.extract_strided_slice %161 {offsets = [96, 0], sizes = [16, 16], strides = [1, 1]} : vector<128x16xf32> to vector<16x16xf32>
    %174 = arith.addf %172, %173 : vector<16x16xf32>
    %175 = vector.extract_strided_slice %161 {offsets = [112, 0], sizes = [16, 16], strides = [1, 1]} : vector<128x16xf32> to vector<16x16xf32>
    %176 = arith.addf %174, %175 : vector<16x16xf32>
    %177 = vector.broadcast %121 : vector<1x1xf32> to vector<16x16xf32>
    %178 = arith.addf %177, %176 : vector<16x16xf32>
    %cst_47 = arith.constant dense<0.000000e+00> : vector<16x16xf32>
    %179 = tpu.matmul %140, %159, %cst_47 {dimension_numbers = #tpu.dot_dimension_numbers<[1], [1], [0], [0], [0, 0, 1, 0], [], []>} : vector<16x16xf32>, vector<16x16xf32>, vector<16x16xf32> -> vector<16x16xf32>
    %cst_48 = arith.constant dense<0xFF800000> : vector<16xf32>
    %180 = vector.multi_reduction <maximumf>, %179, %cst_48 [1] : vector<16x16xf32> to vector<16xf32>
    %181 = vector.shape_cast %180 : vector<16xf32> to vector<16x1xf32>
    %182 = vector.broadcast %181 : vector<16x1xf32> to vector<16x16xf32>
    %183 = arith.subf %179, %182 : vector<16x16xf32>
    %184 = math.exp %183 : vector<16x16xf32>
    %cst_49 = arith.constant dense<0.000000e+00> : vector<16xf32>
    %185 = vector.multi_reduction <add>, %184, %cst_49 [1] : vector<16x16xf32> to vector<16xf32>
    %186 = vector.shape_cast %185 : vector<16xf32> to vector<16x1xf32>
    %187 = tpu.reciprocal %186 {approx = true} : vector<16x1xf32> -> vector<16x1xf32>
    %188 = vector.broadcast %187 : vector<16x1xf32> to vector<16x16xf32>
    %189 = arith.mulf %184, %188 : vector<16x16xf32>
    %cst_50 = arith.constant dense<0.000000e+00> : vector<16x16xf32>
    %190 = tpu.matmul %189, %178, %cst_50 {dimension_numbers = #tpu.dot_dimension_numbers<[1], [0], [0], [1], [0, 0, 1, 1], [], []>} : vector<16x16xf32>, vector<16x16xf32>, vector<16x16xf32> -> vector<16x16xf32>
    %191 = arith.addf %190, %178 : vector<16x16xf32>
    %c0_51 = arith.constant 0 : index
    %c0_52 = arith.constant 0 : index
    %c0_53 = arith.constant 0 : index
    %c0_54 = arith.constant 0 : index
    %192 = vector.load %arg6[%c0_51, %c0_52, %c0_53, %c0_54] : memref<1x1x16x16xf32, #tpu.memory_space<vmem>>, vector<1x1x16x16xf32>
    %193 = vector.shape_cast %192 : vector<1x1x16x16xf32> to vector<16x16xf32>
    %194 = vector.shape_cast %191 : vector<16x16xf32> to vector<1x1x16x16xf32>
    tpu.vector_store %arg6[%c0_51, %c0_52, %c0_53, %c0_54], %194 {strides = array<i32>} : memref<1x1x16x16xf32, #tpu.memory_space<vmem>>, vector<1x1x16x16xf32>,
    return
  }
  func.func @transform_0(%arg0: i32) -> (i32, i32, i32) {
    %c0_i32 = arith.constant 0 : i32
    %c0_i32_0 = arith.constant 0 : i32
    %c0_i32_1 = arith.constant 0 : i32
    return %arg0, %c0_i32, %c0_i32_0 : i32, i32, i32
  }
  func.func @transform_1(%arg0: i32) -> (i32, i32) {
    %c0_i32 = arith.constant 0 : i32
    %c0_i32_0 = arith.constant 0 : i32
    %c0_i32_1 = arith.constant 0 : i32
    return %c0_i32, %c0_i32_0 : i32, i32
  }
  func.func @transform_2(%arg0: i32) -> (i32, i32) {
    %c0_i32 = arith.constant 0 : i32
    %c0_i32_0 = arith.constant 0 : i32
    %c0_i32_1 = arith.constant 0 : i32
    return %c0_i32, %c0_i32_0 : i32, i32
  }
  func.func @transform_3(%arg0: i32) -> (i32, i32) {
    %c0_i32 = arith.constant 0 : i32
    %c0_i32_0 = arith.constant 0 : i32
    %c0_i32_1 = arith.constant 0 : i32
    return %c0_i32, %c0_i32_0 : i32, i32
  }
  func.func @transform_4(%arg0: i32) -> (i32, i32) {
    %c0_i32 = arith.constant 0 : i32
    %c0_i32_0 = arith.constant 0 : i32
    %c0_i32_1 = arith.constant 0 : i32
    return %c0_i32, %c0_i32_0 : i32, i32
  }
  func.func @transform_5(%arg0: i32) -> (i32, i32, i32, i32) {
    %c0_i32 = arith.constant 0 : i32
    %c0_i32_0 = arith.constant 0 : i32
    %c0_i32_1 = arith.constant 0 : i32
    %c0_i32_2 = arith.constant 0 : i32
    return %arg0, %c0_i32, %c0_i32_0, %c0_i32_1 : i32, i32, i32, i32
  }
}

</mosaic_0001>

<bundles_post_ra>
// kernel: union_attention_forward.1
= control target key start
LH: loop header
LB: loop body
LE: loop exit
PB: predicated region body
PF: predicated region fallthrough
CT: control target
= control target key end

     0   :  { %10 = vsyncpa [#allocation3], 0  ;;  %s2252_s0 = inlined_call_operand.hbm [shape: f32[2,128,16], index: 0, kind: input, shape index: {}]   ;;  %s2253_s1 = inlined_call_operand.vmem [shape: f32[24,8], index: 1, kind: input, shape index: {}]   ;;  %s2254_s2 = inlined_call_operand.vmem [shape: f32[24,1], index: 2, kind: input, shape index: {}]   ;;  %s2255_s3 = inlined_call_operand.vmem [shape: f32[8,8], index: 3, kind: input, shape index: {}]   ;;  %s2256_s4 = inlined_call_operand.vmem [shape: f32[40,1], index: 4, kind: input, shape index: {}]   ;;  %s2257_s5 = inlined_call_operand.hbm [shape: f32[2,1,16,16], index: 5, kind: output, shape index: {}]  }
   0x1   :  { %12 = vsyncpa [#allocation3 + $0x1], 0 }
   0x2   :  { %13 = vsyncpa [#allocation4], 0 }
   0x3   :  { %15 = vsyncpa [#allocation4 + $0x1], 0  ;;  %s1758_s18 = smov 0   ;;  %s1760_s19 = smov 0  }
   0x4   :  { %s1762_s20 = smov 0   ;;  %s1764_s21 = smov 0  }
   0x5 LB: > { %s1779_s22 = sadd.s32 4294967295, %s1719_s21   ;;  %s1452_s23 = sadd.s32 4294967294, %s1719_s21   ;;  %s1719_s21 = sphi %s1764_s21, %s2267_s21   ;;  %s1715_s20 = sphi %s1762_s20, %s2266_s20   ;;  %s1711_s19 = sphi %s1760_s19, %s2265_s19   ;;  %s1707_s18 = sphi %s1758_s18, %s2264_s18  }
   0x6   : > { %s1783_s24 = sadd.s32 1, %s1719_s21   ;;  %s28_s25 = sadd.s32 1, %s1715_s20 }
   0x7   : > { %s25_s26 = ssub.s32 %s1719_s21, %s1783_s24  ;;  %p35_p0 = scmp.ne.s32.totalorder %s1715_s20, %s1711_s19 }
   0x8   : > { %p26_p1 = scmp.eq.s32.totalorder %s25_s26, 0  ;;  %p36_p2 = scmp.eq.s32.totalorder %s1719_s21, 0 }
   0x9   : > { %p41_p3 = scmp.ne.s32.totalorder %s1711_s19, %s1707_s18  ;;  %p42_p4 = scmp.eq.s32.totalorder %s1779_s22, 0 }
   0xa   : > { %s1795_s27 = scalar_select %p26_p1, %s1715_s20, %s28_s25  }
   0xb   : > { %p1797_p5 = por %p36_p2, %p35_p0  ;;  %p1801_p6 = por %p42_p4, %p41_p3 }
   0xc   : > { %p149_p7 = scmp.eq.s32.totalorder %s1779_s22, 1  ;;  %p155_p8 = scmp.eq.s32.totalorder %s1452_s23, 1 }
   0xd   : > { %p1547_p10 = scmp.lt.s32.totalorder %s1719_s21, 2  ;;  %s187_s7 = sand.u32 1, %s1715_s20  }
   0xe   : > { %p1808_p11 = por %p149_p7, %p35_p0  ;;  %p1812_p12 = por %p155_p8, %p41_p3 }
   0xf   : > { %s1531_s8 = sshll.u32 %s1719_s21, 7  ;;  %s1455_s9 = sshll.u32 %s187_s7, 7 }
  0x10   : > { %s196_s12 = scalar_lea.hbm %s2252_s0, %s1531_s8  ;;  %s191_s14 = scalar_lea.vmem [#allocation2], %s1455_s9 }
  0x11   : > { %s197_s13 = sshll.u32 %s196_s12, 4  ;;  %s199_s15 = sshll.u32 %s191_s14, 4  ;;  %s198_s13 = int_to_ptr.hbm [resolvable:$true] %s197_s13  ;;  %s200_s15 = int_to_ptr.vmem [resolvable:$true] %s199_s15 }
  0x12   : > { %p1823_p13 = pnand %p1547_p10, %p1797_p5  ;;  %p1458_p0 = scmp.ge.s32.totalorder %s1719_s21, 1 }
  0x13   : > { %p207_p1 = scmp.lt.s32.totalorder %s1719_s21, 3  ;;  %s188_s17 = scalar_lea.sflag [#allocation3], %s187_s7 }
  0x14   : > { %s1623_s23 = sshra.s32 %s198_s13, 4  ;;  %p1627_p3 = pneg %p1823_p13  ;;  %s1624_s23 = int_to_ptr.hbm [resolvable:$true] %s1623_s23 }
  0x15   : > { %s1625_s25 = scalar_lea.hbm %s1624_s23, 128  ;;  %s1630_s28 = scalar_lea.hbm %s2252_s0, 256 }
  0x16   : > { %p1626_p2 = scmp.ne.s32.totalorder %s1624_s23, %s1625_s25  ;;  %p1631_p5 = scmp.lt.s32.totalorder %s1624_s23, %s2252_s0 }
  0x17   : > { %p1632_p8 = scmp.lt.s32.totalorder %s1630_s28, %s1625_s25 }
  0x18   : > { %p1628_p4 = pnand %p1627_p3, %p1626_p2 }
  0x19   : > { %p1633_p10 = por %p1632_p8, %p1631_p5 }
  0x1a   : > { %p1629_p7 = pneg %p1628_p4 }
  0x1c   : > { %p1634_p9 = pnand %p1633_p10, %p1629_p7 }
  0x1e   : > { %1637 = shalt.err (!%p1634_p9)
}
  0x1f   : > { %s1721_s7 = smov 128   ;;  %s1722_s11 = smov 8  }
  0x20   : > { %1542 = dma.hbm_to_vmem [thread:$0]  (!%p1823_p13), %s198_s13, 2048, %s200_s15, %s188_s17, %s1721_s7, %s1721_s7, %s1722_s11  }
  0x21   : > { %p208_p2 = pnand %p1458_p0, %p207_p1 }
  0x22   : > { %s1844_s12 = sand.u32 (!%p208_p2), 1, %s1711_s19  }
  0x23   : > { %211 = sbr.rel (%p208_p2) target bundleno = 2332 (0x91c), region = 40  ;;  %s1459_s14 = sshll.u32 (!%p208_p2), %s1844_s12, 7 }
  0x24   : > { %s214_s23 = scalar_lea.sflag (!%p208_p2), [#allocation3], %s1844_s12  ;;  %s1848_s25 = scalar_lea.vmem (!%p208_p2), [#allocation2], %s1459_s14 }
  0x28   : > { %1698 = dma.done.wait (%p1801_p6), %s214_s23, 2048  }
  0x29   : > { %1700 = vsyncadd (%p1801_p6), %s214_s23, 4294965248  ;;  %vm367_vm0 = vcmask 130048   ;;  %v366_v0 = vld [vmem:[%s1848_s25 + $0x78] sm:$0xff]  ;;  %v364_v1 = vld [vmem:[%s1848_s25 + $0x68] sm:$0xff]  ;;  %v245_v41 = vlaneseq  ;;  %v1723_v54 = vmov 1.0   ;;  %vm437_vm4 = vcmask 64512  }
  0x2a   : > { %v362_v2 = vld [vmem:[%s1848_s25 + $0x58] sm:$0xff]  ;;  %v413_v3 = vsel %vm367_vm0, %v366_v0, 0.0  ;;  %v407_v4 = vsel %vm367_vm0, %v364_v1, 0.0  ;;  %v365_v6 = vld [vmem:[%s1848_s25 + $0x70] sm:$0xff]  ;;  %v363_v7 = vld [vmem:[%s1848_s25 + $0x60] sm:$0xff]  ;;  %vm473_vm5 = vcmask 7168  }
  0x2b   : > { %v401_v5 = vsel %vm367_vm0, %v362_v2, 0.0  ;;  %414 = vadd.xlane.f32.xlu0 %v413_v3  ;;  %408 = vadd.xlane.f32.xlu1 %v407_v4  ;;  %v361_v8 = vld [vmem:[%s1848_s25 + $0x50] sm:$0xff]  ;;  %v410_v9 = vsel %vm367_vm0, %v365_v6, 0.0  ;;  %v404_v10 = vsel %vm367_vm0, %v363_v7, 0.0  ;;  %v1867_v12 = vld [vmem:[%s1848_s25 + $0x48] sm:$0xff]  ;;  %v1870_v13 = vld [vmem:[%s1848_s25 + $0x40] sm:$0xff] }
  0x2c   : > { %402 = vadd.xlane.f32.xlu2 %v401_v5  ;;  %v398_v11 = vsel %vm367_vm0, %v361_v8, 0.0  ;;  %v1873_v14 = vld [vmem:[%s1848_s25 + $0x38] sm:$0xff]  ;;  %v395_v15 = vsel %vm367_vm0, %v1867_v12, 0.0  ;;  %v392_v16 = vsel %vm367_vm0, %v1870_v13, 0.0  ;;  %v1882_v18 = vld [vmem:[%s1848_s25 + $0x30] sm:$0xff]  ;;  %v1885_v19 = vld [vmem:[%s1848_s25 + $0x28] sm:$0xff] }
  0x2d   : > { %v389_v17 = vsel %vm367_vm0, %v1873_v14, 0.0  ;;  %v1888_v20 = vld [vmem:[%s1848_s25 + $0x20] sm:$0xff]  ;;  %v386_v21 = vsel %vm367_vm0, %v1882_v18, 0.0  ;;  %v383_v22 = vsel %vm367_vm0, %v1885_v19, 0.0  ;;  %v1897_v24 = vld [vmem:[%s1848_s25 + $0x18] sm:$0xff]  ;;  %v1900_v25 = vld [vmem:[%s1848_s25 + $0x10] sm:$0xff] }
  0x2e   : > { %v380_v23 = vsel %vm367_vm0, %v1888_v20, 0.0  ;;  %v1903_v26 = vld [vmem:[%s1848_s25 + $0x8] sm:$0xff]  ;;  %v377_v27 = vsel %vm367_vm0, %v1897_v24, 0.0  ;;  %v374_v28 = vsel %vm367_vm0, %v1900_v25, 0.0  ;;  %v1912_v30 = vld [vmem:[%s1848_s25] sm:$0xff]  ;;  %v1916_v44 = vshrl.u32 %v245_v41, 7 }
  0x2f   : > { %v371_v29 = vsel %vm367_vm0, %v1903_v26, 0.0  ;;  %v368_v31 = vsel %vm367_vm0, %v1912_v30, 0.0  ;;  %v1919_v49 = vand.u32 127, %v245_v41  ;;  %v344_v57 = vld [vmem:[%s2253_s1] sm:$0xff]  ;;  %v345_v58 = vld [vmem:[%s2253_s1 + $0x8] sm:$0xff]  ;;  %v346_v3 = vld [vmem:[%s2253_s1 + $0x10] sm:$0xff] }
  0x30   : > { %v252_v46 = vadd.s32 1, %v1916_v44  ;;  %v250_v50 = vmul.u32 16, %v1916_v44  ;;  %v348_v60 = vld [vmem:[%s2254_s2 + $0x8] sm:$0xff]  ;;  %v347_v62 = vld [vmem:[%s2254_s2] sm:$0xff]  ;;  %s1532_s7 = sshll.u32 %s1779_s22, 4  ;;  %s1364_s16 = scalar_lea.sflag [#allocation4], %s1844_s12 }
  0x31   : > { %vm249_vm14 = vcmp.lt.s32.totalorder %v1919_v49, %v1916_v44  ;;  %s1375_s29 = scalar_lea.hbm %s2257_s5, %s1532_s7  ;;  %s1673_s28 = scalar_lea.hbm %s2257_s5, 32 }
  0x32   : > { %v253_v51 = vmul.u32 16, %v252_v46  ;;  %vm251_vm1 = vcmp.ge.s32.totalorder %v1919_v49, %v250_v50  ;;  %s1378_s15 = sshll.u32 %s1375_s29, 4  ;;  %s1379_s15 = int_to_ptr.hbm [resolvable:$true] %s1378_s15 }
  0x33   : > { %411 = vadd.xlane.f32.xlu0 %v410_v9  ;;  %405 = vadd.xlane.f32.xlu1 %v404_v10  ;;  %v349_v10 = vld [vmem:[%s2254_s2 + $0x10] sm:$0xff]  ;;  %s1667_s17 = sshra.s32 %s1379_s15, 4  ;;  %s1668_s17 = int_to_ptr.hbm [resolvable:$true] %s1667_s17 }
  0x34   : > { %399 = vadd.xlane.f32.xlu2 %v398_v11  ;;  %vm254_vm2 = vcmp.lt.s32.totalorder %v1919_v49, %v253_v51  ;;  %s1669_s22 = scalar_lea.hbm %s1668_s17, 16  ;;  %p1674_p0 = scmp.lt.s32.totalorder %s1668_s17, %s2257_s5 }
  0x35   : > { %vm255_vm3 = vmand %vm251_vm1, %vm254_vm2  ;;  %p1670_p6 = scmp.ne.s32.totalorder %s1668_s17, %s1669_s22  ;;  %p1675_p1 = scmp.lt.s32.totalorder %s1673_s28, %s1669_s22 }
  0x37   : > { %p1671_p9 = pnand %p1670_p6, %p1808_p11  ;;  %p1676_p3 = por %p1675_p1, %p1674_p0 }
  0x39   : > { %p1672_p13 = pneg %p1671_p9 }
  0x3b   : > { %396 = vadd.xlane.f32.xlu0 %v395_v15  ;;  %393 = vadd.xlane.f32.xlu1 %v392_v16  ;;  %p1677_p4 = pnand %p1676_p3, %p1672_p13 }
  0x3c   : > { %390 = vadd.xlane.f32.xlu2 %v389_v17 }
  0x43   : > { %387 = vadd.xlane.f32.xlu0 %v386_v21  ;;  %384 = vadd.xlane.f32.xlu1 %v383_v22 }
  0x44   : > { %381 = vadd.xlane.f32.xlu2 %v380_v23 }
  0x4b   : > { %378 = vadd.xlane.f32.xlu0 %v377_v27  ;;  %375 = vadd.xlane.f32.xlu1 %v374_v28 }
  0x4c   : > { %372 = vadd.xlane.f32.xlu2 %v371_v29 }
  0x53   : > { %369 = vadd.xlane.f32.xlu0 %v368_v31 }
  0x9e   : > { %v415_v32 = vpop.xlane.xlu0 %414  ;;  %v409_v33 = vpop.xlane.xlu1 %408 }
  0x9f   : > { %416 = vmatpush.msra.mxu0 %v415_v32  ;;  %v403_v34 = vpop.xlane.xlu2 %402 }
  0xa6   : > { %v412_v35 = vpop.xlane.xlu0 %411  ;;  %v406_v36 = vpop.xlane.xlu1 %405 }
  0xa7   : > { %417 = vmatpush.msra.mxu0 %v412_v35  ;;  %v400_v37 = vpop.xlane.xlu2 %399 }
  0xa9   : > { %418 = vmatpush.msra.mxu0 %v409_v33 }
  0xab   : > { %419 = vmatpush.msra.mxu0 %v406_v36  ;;  %v1724_v36 = vmov 0  }
  0xac   : > { %1588 = vset.pattern.permute.xlu0 %v1724_v36  ;;  %1589 = vset.pattern.permute.xlu2 %v1724_v36 }
  0xad   : > { %420 = vmatpush.msra.mxu0 %v403_v34  ;;  %v350_v34 = vld [vmem:[%s2255_s3] sm:$0xff]  ;;  %1590 = vset.pattern.permute.xlu1 %v1724_v36  ;;  %v257_v36 = vadd.s32 8, %v1916_v44 }
  0xae   : > { %v397_v38 = vpop.xlane.xlu0 %396  ;;  %v394_v39 = vpop.xlane.xlu1 %393 }
  0xaf   : > { %421 = vmatpush.msra.mxu0 %v400_v37  ;;  %v391_v40 = vpop.xlane.xlu2 %390 }
  0xb1   : > { %422 = vmatpush.msra.mxu0 %v397_v38 }
  0xb3   : > { %423 = vmatpush.msra.mxu0 %v394_v39 }
  0xb5   : > { %424 = vmatpush.msra.mxu0 %v391_v40 }
  0xb6   : > { %v388_v42 = vpop.xlane.xlu0 %387  ;;  %v385_v43 = vpop.xlane.xlu1 %384 }
  0xb7   : > { %425 = vmatpush.msra.mxu0 %v388_v42  ;;  %v382_v45 = vpop.xlane.xlu2 %381 }
  0xb9   : > { %426 = vmatpush.msra.mxu0 %v385_v43 }
  0xbb   : > { %427 = vmatpush.msra.mxu0 %v382_v45 }
  0xbe   : > { %v379_v47 = vpop.xlane.xlu0 %378  ;;  %v376_v48 = vpop.xlane.xlu1 %375 }
  0xbf   : > { %428 = vmatpush.msra.mxu0 %v379_v47  ;;  %v373_v52 = vpop.xlane.xlu2 %372 }
  0xc1   : > { %429 = vmatpush.msra.mxu0 %v376_v48 }
  0xc3   : > { %430 = vmatpush.msra.mxu0 %v373_v52 }
  0xc6   : > { %v370_v53 = vpop.xlane.xlu0 %369 }
  0xc7   : > { %431 = vmatpush.msra.mxu0 %v370_v53 }
  0xc8   : > { %1461 = vmatmul.msk.f32.vlgmr.msra.gmra.mxu0 %vm255_vm3, %v1723_v54 }
 0x145   : > { %v433_v55 = vpop.f32.mrf.mxu0 }
 0x146   : > { %v436_v56 = vmul.f32 0.00390625, %v433_v55 }
 0x148   : > { %462 = vmatpush.msrb.mxu0 %v436_v56  ;;  %v1725_v56 = vmov 0.0  }
 0x149   : > { %1462 = vmatmul.msk.f32.vlgmr.msrb.gmra.mxu0 %vm437_vm4, %v344_v57 }
 0x151   : > { %1463 = vmatmul.msk.f32.gmra.mxu0 %vm437_vm4, %v345_v58 }
 0x159   : > { %1464 = vmatmul.msk.f32.gmra.mxu0 %vm437_vm4, %v346_v3 }
 0x1c6   : > { %v464_v59 = vpop.f32.mrf.mxu0 }
 0x1c7   : > { %v465_v0 = vadd.f32 %v464_v59, %v347_v62 }
 0x1ce   : > { %v467_v61 = vpop.f32.mrf.mxu0 }
 0x1cf   : > { %v468_v63 = vadd.f32 %v467_v61, %v348_v60 }
 0x1d1   : > { %1465 = vmatpush.xpose.msk.msra.mxu2 %vm473_vm5, %v468_v63 }
 0x1d4   : > { %1466 = vmatmul.msk.f32.vlgmr.msra.gmra.mxu2 %vm473_vm5, %v465_v0 }
 0x1d6   : > { %v470_v9 = vpop.f32.mrf.mxu0 }
 0x1d7   : > { %v471_v11 = vadd.f32 %v470_v9, %v349_v10  ;;  %v289_v9 = vadd.s32 1, %v1919_v49 }
 0x1d9   : > { %542 = vmatpush.msra.mxu3 %v471_v11 }
 0x257   : > { %v497_v1 = vpop.f32.mrf.mxu2 }
 0x258   : > { %v500_v2 = vsel %vm437_vm4, %v497_v1, -inf }
 0x259   : > { %501 = vmax.xlane.f32.xlu1 %v500_v2 }
 0x2cc   : > { %v502_v4 = vpop.xlane.xlu1 %501 }
 0x2cd   : > { %v503_v5 = vsub.f32 %v497_v1, %v502_v4 }
 0x2cf   : > { %v504_v6 = vmul.f32 1.442695, %v503_v5 }
 0x2d1   : > { %1591 = vpow2.f32 %v504_v6 }
 0x2d7   : > { %v1592_v7 = vpop.eup %1591 }
 0x2d8   : > { %v506_v8 = vsel %vm437_vm4, %v1592_v7, 0.0 }
 0x2d9   : > { %507 = vadd.xlane.f32.xlu2 %v506_v8 }
 0x34c   : > { %v508_v15 = vpop.xlane.xlu2 %507 }
 0x34d   : > { %1593 = vrcp.f32 %v508_v15  ;;  %v520_v22 = vand.u32 2147483648, %v508_v15  ;;  %v518_v27 = vand.u32 2147483647, %v508_v15  ;;  %vm514_vm7 = vweird.f32 %v508_v15 }
 0x34f   : > { %v521_v29 = vor.u32 1.1754944e-38, %v520_v22  ;;  %vm519_vm9 = vcmp.eq.f32.partialorder %v518_v27, 8.507059e+37  ;;  %v258_v22 = vadd.s32 16, %v1916_v44  ;;  %v339_v27 = vld [vmem:[%s2256_s4] sm:$0xff] }
 0x353   : > { %v1594_v16 = vpop.eup %1593 }
 0x354   : > { %v510_v17 = vmul.f32 %v1594_v16, %v508_v15  ;;  %vm515_vm6 = vweird.f32 %v1594_v16 }
 0x355   : > { %vm516_vm8 = vmor %vm514_vm7, %vm515_vm6 }
 0x356   : > { %v511_v21 = vsub.f32 1.0, %v510_v17  ;;  %v1968_v17 = vmul.u32 16, %v289_v9 }
 0x358   : > { %v512_v23 = vmul.f32 %v1594_v16, %v511_v21 }
 0x35a   : > { %v513_v28 = vadd.f32 %v1594_v16, %v512_v23 }
 0x35c   : > { %v517_v31 = vsel %vm516_vm8, %v1594_v16, %v513_v28  ;;  %v1966_v16 = vmul.u32 16, %v1919_v49  ;;  %v340_v28 = vld [vmem:[%s2256_s4 + $0x8] sm:$0xff] }
 0x35d   : > { %v522_v32 = vsel %vm519_vm9, %v521_v29, %v517_v31  ;;  %v341_v29 = vld [vmem:[%s2256_s4 + $0x10] sm:$0xff]  ;;  %v342_v31 = vld [vmem:[%s2256_s4 + $0x18] sm:$0xff] }
 0x35e   : > { %v523_v33 = vmul.f32 %v1592_v7, %v522_v32  ;;  %vm273_vm9 = vcmp.ge.s32.totalorder %v1916_v44, %v1966_v16  ;;  %v343_v32 = vld [vmem:[%s2256_s4 + $0x20] sm:$0xff] }
 0x360   : > { %1467 = vmatmul.msk.f32.vlgmr.msra.gmra.mxu3 %vm437_vm4, %v523_v33 }
 0x3e3   : > { %v544_v35 = vpop.f32.mrf.mxu3 }
 0x3e4   : > { %565 = vmatpush.msrb.mxu3 %v544_v35 }
 0x3e5   : > { %1468 = vmatmul.msk.f32.vlgmr.msrb.gmra.mxu3 %vm437_vm4, %v350_v34 }
 0x468   : > { %v567_v37 = vpop.f32.mrf.mxu3 }
 0x469   : > { %v1469_v38 = vmul.f32 -1.442695, %v567_v37 }
 0x46b   : > { %1595 = vpow2.f32 %v1469_v38 }
 0x471   : > { %v1596_v39 = vpop.eup %1595 }
 0x472   : > { %v573_v40 = vadd.f32 1.0, %v1596_v39 }
 0x474   : > { %1597 = vrcp.f32 %v573_v40  ;;  %v585_v45 = vand.u32 2147483648, %v573_v40  ;;  %v583_v47 = vand.u32 2147483647, %v573_v40  ;;  %vm579_vm11 = vweird.f32 %v573_v40 }
 0x476   : > { %v586_v50 = vor.u32 1.1754944e-38, %v585_v45  ;;  %vm584_vm13 = vcmp.eq.f32.partialorder %v583_v47, 8.507059e+37 }
 0x47a   : > { %v1598_v41 = vpop.eup %1597 }
 0x47b   : > { %v575_v42 = vmul.f32 %v1598_v41, %v573_v40  ;;  %vm580_vm10 = vweird.f32 %v1598_v41 }
 0x47c   : > { %vm581_vm12 = vmor %vm579_vm11, %vm580_vm10  ;;  %vm291_vm10 = vcmp.lt.s32.totalorder %v1916_v44, %v1968_v17  ;;  %vm275_vm11 = vcmp.ge.s32.totalorder %v258_v22, %v1966_v16 }
 0x47d   : > { %v576_v43 = vsub.f32 1.0, %v575_v42 }
 0x47f   : > { %v577_v46 = vmul.f32 %v1598_v41, %v576_v43 }
 0x481   : > { %v578_v48 = vadd.f32 %v1598_v41, %v577_v46 }
 0x483   : > { %v582_v51 = vsel %vm581_vm12, %v1598_v41, %v578_v48  ;;  %vm293_vm12 = vcmp.lt.s32.totalorder %v258_v22, %v1968_v17  ;;  %v259_v41 = vadd.s32 24, %v1916_v44  ;;  %v270_v22 = vadd.s32 112, %v1916_v44 }
 0x484   : > { %v587_v52 = vsel %vm584_vm13, %v586_v50, %v582_v51  ;;  %vm307_vm13 = vmand %vm273_vm9, %vm291_vm10 }
 0x485   : > { %616 = vperm.xlu0 %1588, %v587_v52   ;;  %1470 = vmatpush.xpose.msk.msrb.mxu2 %vm473_vm5, %v587_v52  ;;  %v651_v34 = vadd.f32 1.0, %v587_v52  ;;  %v323_v46 = vsel %vm307_vm13, 1.0, %v1725_v56 }
 0x488   : > { %1471 = vmatmul.msk.f32.vlgmr.msrb.gmra.mxu2 %vm473_vm5, %v1723_v54 }
 0x4f7   : > { %v617_v53 = vpop.permute.xlu0 %616 }
 0x50b   : > { %v612_v55 = vpop.f32.mrf.mxu2 }
 0x50c   : > { %vm619_vm15 = vcmp.lt.f32.partialorder %v612_v55, %v617_v53  ;;  %vm620_vm1 = vcmp.eq.f32.partialorder %v612_v55, %v617_v53  ;;  %v260_v53 = vadd.s32 32, %v1916_v44 }
 0x50d   : > { %vm621_vm2 = vmand %vm620_vm1, %vm249_vm14  ;;  %vm292_vm1 = vcmp.lt.s32.totalorder %v257_v36, %v1968_v17 }
 0x50e   : > { %vm622_vm3 = vmor %vm619_vm15, %vm621_vm2  ;;  %vm274_vm15 = vcmp.ge.s32.totalorder %v257_v36, %v1966_v16  ;;  %vm276_vm2 = vcmp.ge.s32.totalorder %v259_v41, %v1966_v16  ;;  %vm295_vm9 = vcmp.lt.s32.totalorder %v260_v53, %v1968_v17 }
 0x50f   : > { %v623_v57 = vsel %vm622_vm3, 1.0, %v1725_v56  ;;  %vm309_vm14 = vmand %vm275_vm11, %vm293_vm12  ;;  %vm294_vm3 = vcmp.lt.s32.totalorder %v259_v41, %v1968_v17 }
 0x510   : > { %v624_v58 = vsel %vm437_vm4, %v623_v57, 0.0  ;;  %v325_v47 = vsel %vm309_vm14, 1.0, %v1725_v56 }
 0x511   : > { %625 = vadd.xlane.f32.xlu1 %v624_v58 }
 0x584   : > { %v626_v59 = vpop.xlane.xlu1 %625 }
 0x585   : > { %vm627_vm6 = vcmp.eq.f32.partialorder %v626_v59, 0.0  ;;  %vm636_vm7 = vcmp.eq.f32.partialorder %v626_v59, 1.0 }
 0x586   : > { %v628_v60 = vsel %vm627_vm6, %v587_v52, 0.0  ;;  %v637_v54 = vsel %vm636_vm7, %v587_v52, 0.0  ;;  %vm308_vm6 = vmand %vm274_vm15, %vm292_vm1 }
 0x587   : > { %v629_v61 = vsel %vm473_vm5, %v628_v60, 0.0  ;;  %v638_v62 = vsel %vm473_vm5, %v637_v54, 0.0  ;;  %vm310_vm7 = vmand %vm276_vm2, %vm294_vm3  ;;  %v324_v57 = vsel %vm308_vm6, 1.0, %v1725_v56  ;;  %v261_v54 = vadd.s32 40, %v1916_v44 }
 0x588   : > { %v630_v63 = vrot.slane %v629_v61, 4  ;;  %v639_v0 = vrot.slane %v638_v62, 4  ;;  %v326_v58 = vsel %vm310_vm7, 1.0, %v1725_v56 }
 0x589   : > { %vm278_vm11 = vcmp.ge.s32.totalorder %v261_v54, %v1966_v16  ;;  %vm296_vm12 = vcmp.lt.s32.totalorder %v261_v54, %v1968_v17 }
 0x58a   : > { %v631_v1 = vadd.f32 %v630_v63, %v629_v61  ;;  %v640_v2 = vadd.f32 %v639_v0, %v638_v62  ;;  %vm312_vm13 = vmand %vm278_vm11, %vm296_vm12  ;;  %v262_v62 = vadd.s32 48, %v1916_v44  ;;  %v263_v0 = vadd.s32 56, %v1916_v44 }
 0x58b   : > { %v328_v63 = vsel %vm312_vm13, 1.0, %v1725_v56 }
 0x58c   : > { %v632_v3 = vrot.slane %v631_v1, 2  ;;  %v641_v4 = vrot.slane %v640_v2, 2  ;;  %vm279_vm14 = vcmp.ge.s32.totalorder %v262_v62, %v1966_v16  ;;  %vm297_vm15 = vcmp.lt.s32.totalorder %v262_v62, %v1968_v17 }
 0x58d   : > { %vm313_vm1 = vmand %vm279_vm14, %vm297_vm15  ;;  %vm280_vm2 = vcmp.ge.s32.totalorder %v263_v0, %v1966_v16  ;;  %vm298_vm3 = vcmp.lt.s32.totalorder %v263_v0, %v1968_v17 }
 0x58e   : > { %v633_v5 = vadd.f32 %v632_v3, %v631_v1  ;;  %v642_v6 = vadd.f32 %v641_v4, %v640_v2  ;;  %v329_v1 = vsel %vm313_vm1, 1.0, %v1725_v56  ;;  %vm314_vm6 = vmand %vm280_vm2, %vm298_vm3  ;;  %v264_v2 = vadd.s32 64, %v1916_v44 }
 0x58f   : > { %v330_v3 = vsel %vm314_vm6, 1.0, %v1725_v56  ;;  %v265_v4 = vadd.s32 72, %v1916_v44 }
 0x590   : > { %v634_v7 = vrot.slane %v633_v5, 1  ;;  %v643_v8 = vrot.slane %v642_v6, 1  ;;  %vm281_vm7 = vcmp.ge.s32.totalorder %v264_v2, %v1966_v16 }
 0x591   : > { %vm300_vm11 = vcmp.lt.s32.totalorder %v265_v4, %v1968_v17 }
 0x592   : > { %v635_v10 = vadd.f32 %v634_v7, %v633_v5  ;;  %v644_v11 = vadd.f32 %v643_v8, %v642_v6  ;;  %v266_v6 = vadd.s32 80, %v1916_v44  ;;  %v267_v8 = vadd.s32 88, %v1916_v44 }
 0x594   : > { %v645_v15 = vsub.f32 %v644_v11, %v635_v10  ;;  %vm283_vm13 = vcmp.ge.s32.totalorder %v266_v6, %v1966_v16  ;;  %vm301_vm14 = vcmp.lt.s32.totalorder %v266_v6, %v1968_v17  ;;  %vm284_vm1 = vcmp.ge.s32.totalorder %v267_v8, %v1966_v16 }
 0x595   : > { %vm317_vm15 = vmand %vm283_vm13, %vm301_vm14  ;;  %vm302_vm2 = vcmp.lt.s32.totalorder %v267_v8, %v1968_v17  ;;  %vm305_vm13 = vcmp.lt.s32.totalorder %v270_v22, %v1968_v17 }
 0x596   : > { %v646_v21 = vmul.f32 0.7, %v645_v15  ;;  %v333_v9 = vsel %vm317_vm15, 1.0, %v1725_v56  ;;  %vm318_vm3 = vmand %vm284_vm1, %vm302_vm2  ;;  %v269_v15 = vadd.s32 104, %v1916_v44 }
 0x597   : > { %v334_v11 = vsel %vm318_vm3, 1.0, %v1725_v56 }
 0x598   : > { %v647_v23 = vadd.f32 %v646_v21, %v635_v10  ;;  %v268_v10 = vadd.s32 96, %v1916_v44 }
 0x59a   : > { %vm648_vm8 = vcmp.le.f32.partialorder %v587_v52, %v647_v23  ;;  %vm285_vm6 = vcmp.ge.s32.totalorder %v268_v10, %v1966_v16 }
 0x59b   : > { %v649_v49 = vsel %vm648_vm8, 0.0, %v587_v52  ;;  %vm277_vm8 = vcmp.ge.s32.totalorder %v260_v53, %v1966_v16 }
 0x59c   : > { %v650_v33 = vmul.f32 %v649_v49, %v339_v27  ;;  %v653_v35 = vmul.f32 %v649_v49, %v340_v28  ;;  %vm311_vm10 = vmand %vm277_vm8, %vm295_vm9  ;;  %vm299_vm8 = vcmp.lt.s32.totalorder %v264_v2, %v1968_v17  ;;  %v271_v27 = vadd.s32 120, %v1916_v44 }
 0x59d   : > { %v327_v61 = vsel %vm311_vm10, 1.0, %v1725_v56  ;;  %vm315_vm9 = vmand %vm281_vm7, %vm299_vm8  ;;  %vm282_vm10 = vcmp.ge.s32.totalorder %v265_v4, %v1966_v16  ;;  %vm303_vm7 = vcmp.lt.s32.totalorder %v268_v10, %v1968_v17 }
 0x59e   : > { %v652_v37 = vmul.f32 %v651_v34, %v650_v33  ;;  %v1993_v38 = vmul.f32 %v653_v35, %v343_v32  ;;  %v908_v39 = vmul.f32 %v653_v35, %v342_v31  ;;  %v1995_v40 = vmul.f32 %v653_v35, %v341_v29  ;;  %vm316_vm12 = vmand %vm282_vm10, %vm300_vm11 }
 0x59f   : > { %v331_v5 = vsel %vm315_vm9, 1.0, %v1725_v56  ;;  %v332_v7 = vsel %vm316_vm12, 1.0, %v1725_v56  ;;  %vm319_vm8 = vmand %vm285_vm6, %vm303_vm7  ;;  %vm286_vm9 = vcmp.ge.s32.totalorder %v269_v15, %v1966_v16  ;;  %vm304_vm10 = vcmp.lt.s32.totalorder %v269_v15, %v1968_v17 }
 0x5a0   : > { %v654_v42 = vmul.f32 %v652_v37, %v341_v29  ;;  %v768_v43 = vmul.f32 %v652_v37, %v342_v31  ;;  %v834_v45 = vmul.f32 %v652_v37, %v343_v32  ;;  %v909_v48 = vsel %vm473_vm5, %v908_v39, 0.0  ;;  %vm320_vm11 = vmand %vm286_vm9, %vm304_vm10 }
 0x5a1   : > { %v910_v50 = vrot.slane %v909_v48, 4  ;;  %v335_v21 = vsel %vm319_vm8, 1.0, %v1725_v56  ;;  %v336_v23 = vsel %vm320_vm11, 1.0, %v1725_v56  ;;  %vm287_vm12 = vcmp.ge.s32.totalorder %v270_v22, %v1966_v16 }
 0x5a2   : > { %718 = vmatpush.msra.mxu0 %v654_v42  ;;  %1533 = vmatpush.msra.mxu3 %v654_v42  ;;  %vm321_vm14 = vmand %vm287_vm12, %vm305_vm13  ;;  %vm288_vm15 = vcmp.ge.s32.totalorder %v271_v27, %v1966_v16  ;;  %vm306_vm1 = vcmp.lt.s32.totalorder %v271_v27, %v1968_v17 }
 0x5a3   : > { %1534 = vmatpush.msra.mxu2 %v768_v43  ;;  %850 = vmatpush.msra.mxu1 %v834_v45  ;;  %v911_v51 = vadd.f32 %v910_v50, %v909_v48  ;;  %v337_v28 = vsel %vm321_vm14, 1.0, %v1725_v56  ;;  %vm322_vm2 = vmand %vm288_vm15, %vm306_vm1 }
 0x5a4   : > { %1472 = vmatmul.msk.f32.vlgmr.msra.gmra.mxu0 %vm437_vm4, %v323_v46  ;;  %1474 = vmatmul.msk.f32.vlgmr.msra.gmra.mxu3 %vm437_vm4, %v325_v47  ;;  %v338_v49 = vsel %vm322_vm2, 1.0, %v1725_v56 }
 0x5a5   : > { %784 = vmatpush.msrb.mxu0 %v768_v43  ;;  %1490 = vmatmul.msk.f32.vlgmr.msra.gmra.mxu2 %vm437_vm4, %v325_v47  ;;  %v912_v52 = vrot.slane %v911_v51, 2 }
 0x5a6   : > { %1504 = vmatmul.msk.f32.vlgmr.msra.gmra.mxu1 %vm437_vm4, %v323_v46 }
 0x5a7   : > { %v913_v55 = vadd.f32 %v912_v52, %v911_v51 }
 0x5a9   : > { %v914_v59 = vrot.slane %v913_v55, 1 }
 0x5ab   : > { %v915_v60 = vadd.f32 %v914_v59, %v913_v55 }
 0x5ac   : > { %1473 = vmatmul.msk.f32.gmra.mxu0 %vm437_vm4, %v324_v57  ;;  %1475 = vmatmul.msk.f32.gmra.mxu3 %vm437_vm4, %v326_v58 }
 0x5ad   : > { %1491 = vmatmul.msk.f32.gmra.mxu2 %vm437_vm4, %v326_v58  ;;  %1153 = vperm.xlu2 %1589, %v915_v60  }
 0x5ae   : > { %1505 = vmatmul.msk.f32.gmra.mxu1 %vm437_vm4, %v324_v57 }
 0x5b4   : > { %1476 = vmatmul.msk.f32.gmra.mxu3 %vm437_vm4, %v327_v61  ;;  %1488 = vmatmul.msk.f32.vlgmr.msrb.gmra.mxu0 %vm437_vm4, %v323_v46 }
 0x5b5   : > { %1492 = vmatmul.msk.f32.gmra.mxu2 %vm437_vm4, %v327_v61 }
 0x5b6   : > { %1506 = vmatmul.msk.f32.gmra.mxu1 %vm437_vm4, %v325_v47 }
 0x5bc   : > { %1477 = vmatmul.msk.f32.gmra.mxu3 %vm437_vm4, %v328_v63  ;;  %1489 = vmatmul.msk.f32.gmra.mxu0 %vm437_vm4, %v324_v57 }
 0x5bd   : > { %1493 = vmatmul.msk.f32.gmra.mxu2 %vm437_vm4, %v328_v63 }
 0x5be   : > { %1507 = vmatmul.msk.f32.gmra.mxu1 %vm437_vm4, %v326_v58 }
 0x5c4   : > { %1478 = vmatmul.msk.f32.gmra.mxu3 %vm437_vm4, %v329_v1 }
 0x5c5   : > { %1494 = vmatmul.msk.f32.gmra.mxu2 %vm437_vm4, %v329_v1 }
 0x5c6   : > { %1508 = vmatmul.msk.f32.gmra.mxu1 %vm437_vm4, %v327_v61  ;;  %v901_v61 = vsel %vm473_vm5, %v1995_v40, 0.0 }
 0x5cc   : > { %1479 = vmatmul.msk.f32.gmra.mxu3 %vm437_vm4, %v330_v3 }
 0x5cd   : > { %1495 = vmatmul.msk.f32.gmra.mxu2 %vm437_vm4, %v330_v3 }
 0x5ce   : > { %1509 = vmatmul.msk.f32.gmra.mxu1 %vm437_vm4, %v328_v63  ;;  %v902_v63 = vrot.slane %v901_v61, 4 }
 0x5d4   : > { %1480 = vmatmul.msk.f32.gmra.mxu3 %vm437_vm4, %v331_v5 }
 0x5d5   : > { %1496 = vmatmul.msk.f32.gmra.mxu2 %vm437_vm4, %v331_v5 }
 0x5d6   : > { %1510 = vmatmul.msk.f32.gmra.mxu1 %vm437_vm4, %v329_v1  ;;  %v903_v1 = vadd.f32 %v902_v63, %v901_v61 }
 0x5d8   : > { %v904_v4 = vrot.slane %v903_v1, 2 }
 0x5da   : > { %v905_v6 = vadd.f32 %v904_v4, %v903_v1 }
 0x5dc   : > { %1481 = vmatmul.msk.f32.gmra.mxu3 %vm437_vm4, %v332_v7 }
 0x5dd   : > { %1497 = vmatmul.msk.f32.gmra.mxu2 %vm437_vm4, %v332_v7 }
 0x5de   : > { %1511 = vmatmul.msk.f32.gmra.mxu1 %vm437_vm4, %v330_v3 }
 0x5e4   : > { %1482 = vmatmul.msk.f32.gmra.mxu3 %vm437_vm4, %v333_v9 }
 0x5e5   : > { %1498 = vmatmul.msk.f32.gmra.mxu2 %vm437_vm4, %v333_v9 }
 0x5e6   : > { %1512 = vmatmul.msk.f32.gmra.mxu1 %vm437_vm4, %v331_v5 }
 0x5ec   : > { %1483 = vmatmul.msk.f32.gmra.mxu3 %vm437_vm4, %v334_v11 }
 0x5ed   : > { %1499 = vmatmul.msk.f32.gmra.mxu2 %vm437_vm4, %v334_v11 }
 0x5ee   : > { %1513 = vmatmul.msk.f32.gmra.mxu1 %vm437_vm4, %v332_v7 }
 0x5f4   : > { %1484 = vmatmul.msk.f32.gmra.mxu3 %vm437_vm4, %v335_v21 }
 0x5f5   : > { %1500 = vmatmul.msk.f32.gmra.mxu2 %vm437_vm4, %v335_v21 }
 0x5f6   : > { %1514 = vmatmul.msk.f32.gmra.mxu1 %vm437_vm4, %v333_v9  ;;  %v906_v9 = vrot.slane %v905_v6, 1 }
 0x5f8   : > { %v907_v10 = vadd.f32 %v906_v9, %v905_v6 }
 0x5fc   : > { %1485 = vmatmul.msk.f32.gmra.mxu3 %vm437_vm4, %v336_v23 }
 0x5fd   : > { %1501 = vmatmul.msk.f32.gmra.mxu2 %vm437_vm4, %v336_v23 }
 0x5fe   : > { %1515 = vmatmul.msk.f32.gmra.mxu1 %vm437_vm4, %v334_v11 }
 0x604   : > { %1486 = vmatmul.msk.f32.gmra.mxu3 %vm437_vm4, %v337_v28 }
 0x605   : > { %1502 = vmatmul.msk.f32.gmra.mxu2 %vm437_vm4, %v337_v28 }
 0x606   : > { %1516 = vmatmul.msk.f32.gmra.mxu1 %vm437_vm4, %v335_v21 }
 0x607   : > { %v2105_v22 = vpop.permute.xlu2 %1153 }
 0x60c   : > { %1487 = vmatmul.msk.f32.gmra.mxu3 %vm437_vm4, %v338_v49 }
 0x60d   : > { %1503 = vmatmul.msk.f32.gmra.mxu2 %vm437_vm4, %v338_v49 }
 0x60e   : > { %1517 = vmatmul.msk.f32.gmra.mxu1 %vm437_vm4, %v336_v23 }
 0x616   : > { %1518 = vmatmul.msk.f32.gmra.mxu1 %vm437_vm4, %v337_v28 }
 0x61e   : > { %1519 = vmatmul.msk.f32.gmra.mxu1 %vm437_vm4, %v338_v49 }
 0x621   : > { %v720_v44 = vpop.f32.mrf.mxu0 }
 0x622   : > { %926 = vperm.xlu0 %1588, %v720_v44  }
 0x623   : > { %v852_v41 = vpop.f32.mrf.mxu1 }
 0x627   : > { %v726_v16 = vpop.f32.mrf.mxu3 }
 0x628   : > { %v792_v17 = vpop.f32.mrf.mxu2  ;;  %936 = vperm.xlu2 %1589, %v726_v16  }
 0x629   : > { %1053 = vperm.xlu1 %1590, %v792_v17   ;;  %v723_v29 = vpop.f32.mrf.mxu0 }
 0x62a   : > { %931 = vperm.xlu0 %1588, %v723_v29  }
 0x62b   : > { %v855_v46 = vpop.f32.mrf.mxu1 }
 0x62f   : > { %v729_v31 = vpop.f32.mrf.mxu3 }
 0x630   : > { %v795_v56 = vpop.f32.mrf.mxu2  ;;  %941 = vperm.xlu2 %1589, %v729_v31  }
 0x631   : > { %1058 = vperm.xlu1 %1590, %v795_v56   ;;  %v786_v32 = vpop.f32.mrf.mxu0 }
 0x633   : > { %v858_v50 = vpop.f32.mrf.mxu1 }
 0x637   : > { %v732_v33 = vpop.f32.mrf.mxu3 }
 0x638   : > { %v798_v34 = vpop.f32.mrf.mxu2  ;;  %1043 = vperm.xlu2 %1589, %v786_v32  }
 0x639   : > { %v789_v42 = vpop.f32.mrf.mxu0 }
 0x63b   : > { %v861_v55 = vpop.f32.mrf.mxu1 }
 0x63f   : > { %v735_v35 = vpop.f32.mrf.mxu3 }
 0x640   : > { %v801_v36 = vpop.f32.mrf.mxu2  ;;  %951 = vperm.xlu1 %1590, %v735_v35   ;;  %1063 = vperm.xlu2 %1589, %v798_v34  }
 0x643   : > { %v864_v60 = vpop.f32.mrf.mxu1 }
 0x647   : > { %v738_v37 = vpop.f32.mrf.mxu3 }
 0x648   : > { %v804_v39 = vpop.f32.mrf.mxu2  ;;  %946 = vperm.xlu2 %1589, %v732_v33  }
 0x649   : > { %1073 = vperm.xlu1 %1590, %v804_v39  }
 0x64b   : > { %v867_v0 = vpop.f32.mrf.mxu1 }
 0x64f   : > { %v741_v43 = vpop.f32.mrf.mxu3 }
 0x650   : > { %v807_v45 = vpop.f32.mrf.mxu2  ;;  %1048 = vperm.xlu2 %1589, %v789_v42  }
 0x651   : > { %1078 = vperm.xlu0 %1588, %v807_v45  }
 0x653   : > { %v870_v5 = vpop.f32.mrf.mxu1 }
 0x657   : > { %v744_v47 = vpop.f32.mrf.mxu3 }
 0x658   : > { %v810_v48 = vpop.f32.mrf.mxu2  ;;  %1068 = vperm.xlu2 %1589, %v801_v36  }
 0x659   : > { %1083 = vperm.xlu1 %1590, %v810_v48  }
 0x65b   : > { %v873_v11 = vpop.f32.mrf.mxu1 }
 0x65f   : > { %v747_v51 = vpop.f32.mrf.mxu3 }
 0x660   : > { %v813_v52 = vpop.f32.mrf.mxu2  ;;  %956 = vperm.xlu2 %1589, %v738_v37   ;;  %v917_v37 = vsel %vm473_vm5, %v1993_v38, 0.0 }
 0x661   : > { %1088 = vperm.xlu1 %1590, %v813_v52   ;;  %v918_v39 = vrot.slane %v917_v37, 4 }
 0x663   : > { %v876_v21 = vpop.f32.mrf.mxu1  ;;  %v919_v45 = vadd.f32 %v918_v39, %v917_v37 }
 0x667   : > { %v750_v53 = vpop.f32.mrf.mxu3 }
 0x668   : > { %v816_v57 = vpop.f32.mrf.mxu2  ;;  %961 = vperm.xlu2 %1589, %v741_v43  }
 0x669   : > { %1093 = vperm.xlu1 %1590, %v816_v57  }
 0x66b   : > { %v879_v23 = vpop.f32.mrf.mxu1 }
 0x66f   : > { %v753_v58 = vpop.f32.mrf.mxu3 }
 0x670   : > { %v819_v59 = vpop.f32.mrf.mxu2  ;;  %966 = vperm.xlu2 %1589, %v744_v47   ;;  %v920_v47 = vrot.slane %v919_v45, 2 }
 0x671   : > { %976 = vperm.xlu1 %1590, %v750_v53   ;;  %1098 = vperm.xlu0 %1588, %v819_v59  }
 0x672   : > { %v921_v52 = vadd.f32 %v920_v47, %v919_v45  ;;  %v2155_v45 = vld [vmem:[%s1848_s25 + $0x40] sm:$0xff] }
 0x673   : > { %v882_v28 = vpop.f32.mrf.mxu1 }
 0x677   : > { %v756_v54 = vpop.f32.mrf.mxu3 }
 0x678   : > { %v822_v62 = vpop.f32.mrf.mxu2  ;;  %981 = vperm.xlu2 %1589, %v753_v58  }
 0x679   : > { %1103 = vperm.xlu1 %1590, %v822_v62   ;;  %986 = vperm.xlu0 %1588, %v756_v54  }
 0x67b   : > { %v2111_v16 = vpop.f32.mrf.mxu1 }
 0x67f   : > { %v759_v2 = vpop.f32.mrf.mxu3 }
 0x680   : > { %v825_v3 = vpop.f32.mrf.mxu2 }
 0x681   : > { %1108 = vperm.xlu0 %1588, %v825_v3  }
 0x682   : > { %v2107_v27 = vpop.permute.xlu2 %936 }
 0x683   : > { %v2113_v31 = vpop.f32.mrf.mxu1 }
 0x687   : > { %v762_v7 = vpop.f32.mrf.mxu3 }
 0x688   : > { %v828_v8 = vpop.f32.mrf.mxu2  ;;  %996 = vperm.xlu1 %1590, %v762_v7  }
 0x689   : > { %1113 = vperm.xlu0 %1588, %v828_v8  }
 0x68a   : > { %v2109_v44 = vpop.permute.xlu2 %941 }
 0x68b   : > { %v891_v34 = vpop.f32.mrf.mxu1 }
 0x68f   : > { %v765_v40 = vpop.f32.mrf.mxu3 }
 0x690   : > { %v831_v15 = vpop.f32.mrf.mxu2  ;;  %1036 = vperm.xlu1 %1590, %v907_v10   ;;  %1001 = vperm.xlu2 %1589, %v765_v40  }
 0x691   : > { %1118 = vperm.xlu0 %1588, %v831_v15  }
 0x692   : > { %v1044_v29 = vpop.permute.xlu2 %1043 }
 0x693   : > { %v2121_v43 = vpop.f32.mrf.mxu1  ;;  %v1121_v62 = vmul.f32 %v1044_v29, %v1912_v30 }
 0x694   : > { %v927_v33 = vpop.permute.xlu0 %926 }
 0x695   : > { %v1004_v15 = vmul.f32 %v927_v33, %v1912_v30 }
 0x698   : > { %1180 = vperm.xlu1 %1590, %v864_v60   ;;  %1165 = vperm.xlu2 %1589, %v855_v46  }
 0x699   : > { %971 = vperm.xlu0 %1588, %v747_v51  }
 0x69a   : > { %v1064_v32 = vpop.permute.xlu2 %1063 }
 0x69b   : > { %v1054_v49 = vpop.permute.xlu1 %1053  ;;  %v897_v51 = vpop.f32.mrf.mxu1  ;;  %v1125_v9 = vmul.f32 %v1064_v32, %v1888_v20 }
 0x69c   : > { %v2119_v42 = vpop.permute.xlu0 %931  ;;  %v1123_v63 = vmul.f32 %v1054_v49, %v1900_v25  ;;  %v1006_v49 = vmul.f32 %v2107_v27, %v1900_v25 }
 0x69e   : > { %v1137_v4 = vadd.f32 %v1123_v63, %v1121_v62  ;;  %v1007_v63 = vmul.f32 %v2109_v44, %v1897_v24 }
 0x6a0   : > { %1175 = vperm.xlu2 %1589, %v861_v55   ;;  %v922_v55 = vrot.slane %v921_v52, 1 }
 0x6a1   : > { %991 = vperm.xlu0 %1588, %v759_v2  }
 0x6a2   : > { %v947_v36 = vpop.permute.xlu2 %946  ;;  %v923_v58 = vadd.f32 %v922_v55, %v921_v52  ;;  %v2163_v52 = vld [vmem:[%s1848_s25 + $0x78] sm:$0xff] }
 0x6a3   : > { %v1059_v17 = vpop.permute.xlu1 %1058 }
 0x6a4   : > { %v1124_v2 = vmul.f32 %v1059_v17, %v1897_v24  ;;  %v1008_v17 = vmul.f32 %v947_v36, %v1888_v20  ;;  %v2151_v20 = vld [vmem:[%s1848_s25 + $0x60] sm:$0xff] }
 0x6a8   : > { %1160 = vperm.xlu2 %1589, %v852_v41  }
 0x6a9   : > { %1190 = vperm.xlu0 %1588, %v870_v5  }
 0x6aa   : > { %v1049_v46 = vpop.permute.xlu2 %1048 }
 0x6b0   : > { %1170 = vperm.xlu2 %1589, %v858_v50  }
 0x6b1   : > { %1210 = vperm.xlu0 %1588, %v882_v28   ;;  %v2135_v28 = vld [vmem:[%s1848_s25 + $0x58] sm:$0xff] }
 0x6b2   : > { %v2115_v56 = vpop.permute.xlu1 %951  ;;  %v1069_v53 = vpop.permute.xlu2 %1068 }
 0x6b3   : > { %v1126_v3 = vmul.f32 %v1069_v53, %v1885_v19 }
 0x6b8   : > { %1185 = vperm.xlu2 %1589, %v867_v0   ;;  %v1122_v0 = vmul.f32 %v1049_v46, %v1903_v26 }
 0x6ba   : > { %v957_v60 = vpop.permute.xlu2 %956  ;;  %v1138_v5 = vadd.f32 %v1124_v2, %v1122_v0  ;;  %v2173_v0 = vld [vmem:[%s1848_s25 + $0x28] sm:$0xff] }
 0x6bb   : > { %v1074_v35 = vpop.permute.xlu1 %1073  ;;  %v1010_v37 = vmul.f32 %v957_v60, %v1882_v18  ;;  %v1009_v2 = vmul.f32 %v2173_v0, %v2115_v56 }
 0x6bc   : > { %v1140_v10 = vadd.f32 %v1138_v5, %v1126_v3  ;;  %v1127_v40 = vmul.f32 %v1074_v35, %v1882_v18  ;;  %v1020_v35 = vadd.f32 %v1006_v49, %v1004_v15  ;;  %v2180_v5 = vld [vmem:[%s1848_s25 + $0x38] sm:$0xff] }
 0x6c0   : > { %1195 = vperm.xlu2 %1589, %v873_v11  }
 0x6c2   : > { %v962_v1 = vpop.permute.xlu2 %961 }
 0x6c3   : > { %v1079_v48 = vpop.permute.xlu0 %1078 }
 0x6c4   : > { %v1128_v6 = vmul.f32 %v1079_v48, %v1873_v14 }
 0x6c8   : > { %1205 = vperm.xlu2 %1589, %v879_v23   ;;  %v1142_v23 = vadd.f32 %v1140_v10, %v1128_v6 }
 0x6ca   : > { %v967_v32 = vpop.permute.xlu2 %966 }
 0x6cb   : > { %v1084_v41 = vpop.permute.xlu1 %1083  ;;  %v1012_v46 = vmul.f32 %v2155_v45, %v967_v32 }
 0x6cc   : > { %v1129_v19 = vmul.f32 %v1084_v41, %v1870_v13  ;;  %v2146_v13 = vld [vmem:[%s1848_s25 + $0x68] sm:$0xff]  ;;  %v1022_v41 = vadd.f32 %v1020_v35, %v1008_v17 }
 0x6ce   : > { %v1024_v55 = vadd.f32 %v1022_v41, %v1010_v37 }
 0x6d0   : > { %1200 = vperm.xlu2 %1589, %v876_v21   ;;  %v1139_v21 = vadd.f32 %v1137_v4, %v1125_v9  ;;  %v1616_v9 = vld [vmem:[%s1848_s25 + $0x48] sm:$0xff] }
 0x6d2   : > { %v1141_v29 = vadd.f32 %v1139_v21, %v1127_v40  ;;  %v982_v24 = vpop.permute.xlu2 %981 }
 0x6d3   : > { %v1089_v50 = vpop.permute.xlu1 %1088 }
 0x6d4   : > { %v1130_v11 = vmul.f32 %v1089_v50, %v1867_v12  ;;  %v1143_v25 = vadd.f32 %v1141_v29, %v1129_v19 }
 0x6d6   : > { %v1144_v12 = vadd.f32 %v1142_v23, %v1130_v11 }
 0x6d8   : > { %1225 = vperm.xlu2 %1589, %v891_v34   ;;  %v2142_v34 = vld [vmem:[%s1848_s25 + $0x50] sm:$0xff] }
 0x6db   : > { %v1094_v38 = vpop.permute.xlu1 %1093 }
 0x6dc   : > { %v1131_v30 = vmul.f32 %v2142_v34, %v1094_v38  ;;  %v1005_v38 = vmul.f32 %v2119_v42, %v1903_v26 }
 0x6de   : > { %v1145_v48 = vadd.f32 %v1143_v25, %v1131_v30  ;;  %v1021_v42 = vadd.f32 %v1007_v63, %v1005_v38  ;;  %v1618_v63 = vld [vmem:[%s1848_s25 + $0x8] sm:$0xff] }
 0x6e0   : > { %1235 = vperm.xlu2 %1589, %v897_v51   ;;  %v2159_v51 = vld [vmem:[%s1848_s25 + $0x70] sm:$0xff] }
 0x6e3   : > { %v1099_v57 = vpop.permute.xlu0 %1098  ;;  %v977_v54 = vpop.permute.xlu1 %976 }
 0x6e4   : > { %v1132_v14 = vmul.f32 %v2135_v28, %v1099_v57  ;;  %v1014_v57 = vmul.f32 %v2142_v34, %v977_v54 }
 0x6e6   : > { %v1146_v27 = vadd.f32 %v1144_v12, %v1132_v14 }
 0x6e8   : > { %1270 = vperm.xlu2 %1589, %v923_v58  }
 0x6ea   : > { %v1002_v23 = vpop.permute.xlu2 %1001 }
 0x6eb   : > { %v987_v59 = vpop.permute.xlu0 %986  ;;  %v1104_v7 = vpop.permute.xlu1 %1103 }
 0x6ec   : > { %v1133_v36 = vmul.f32 %v2151_v20, %v1104_v7  ;;  %v1016_v62 = vmul.f32 %v2151_v20, %v987_v59  ;;  %v1011_v59 = vmul.f32 %v2180_v5, %v962_v1  ;;  %v1023_v7 = vadd.f32 %v1021_v42, %v1009_v2 }
 0x6ed   : > { %v1015_v1 = vmul.f32 %v2135_v28, %v982_v24 }
 0x6ee   : > { %v1147_v58 = vadd.f32 %v1145_v48, %v1133_v36  ;;  %v1025_v11 = vadd.f32 %v1023_v7, %v1011_v59  ;;  %v1620_v7 = vld [vmem:[%s1848_s25] sm:$0xff] }
 0x6f2   : > { %v1166_v37 = vpop.permute.xlu2 %1165 }
 0x6f3   : > { %v1109_v61 = vpop.permute.xlu0 %1108  ;;  %v1239_v2 = vmul.f32 %v1618_v63, %v1166_v37 }
 0x6f4   : > { %v1134_v33 = vmul.f32 %v2146_v13, %v1109_v61  ;;  %v1026_v61 = vadd.f32 %v1024_v55, %v1012_v46 }
 0x6f6   : > { %v1148_v50 = vadd.f32 %v1146_v27, %v1134_v33  ;;  %v1028_v4 = vadd.f32 %v1026_v61, %v1014_v57  ;;  %v1617_v61 = vld [vmem:[%s1848_s25 + $0x18] sm:$0xff] }
 0x6f8   : > { %v1030_v44 = vadd.f32 %v1028_v4, %v1016_v62 }
 0x6fa   : > { %v997_v39 = vpop.permute.xlu1 %996  ;;  %v1176_v25 = vpop.permute.xlu2 %1175 }
 0x6fb   : > { %v1114_v8 = vpop.permute.xlu0 %1113  ;;  %v1018_v26 = vmul.f32 %v2159_v51, %v997_v39  ;;  %v1241_v62 = vmul.f32 %v1617_v61, %v1176_v25 }
 0x6fc   : > { %v1135_v18 = vmul.f32 %v2159_v51, %v1114_v8 }
 0x6fd   : > { %v1032_v40 = vadd.f32 %v1030_v44, %v1018_v26  ;;  %v1619_v26 = vld [vmem:[%s1848_s25 + $0x10] sm:$0xff] }
 0x6fe   : > { %v1149_v3 = vadd.f32 %v1147_v58, %v1135_v18 }
 0x700   : > { %v1156_v8 = vadd.f32 %v2105_v22, %v1149_v3 }
 0x702   : > { %v1037_v56 = vpop.permute.xlu1 %1036  ;;  %v1161_v27 = vpop.permute.xlu2 %1160 }
 0x703   : > { %v1119_v47 = vpop.permute.xlu0 %1118  ;;  %v1039_v15 = vadd.f32 %v1037_v56, %v1032_v40 }
 0x704   : > { %v1136_v53 = vmul.f32 %v2163_v52, %v1119_v47 }
 0x706   : > { %v1150_v60 = vadd.f32 %v1148_v50, %v1136_v53 }
 0x708   : > { %v1157_v54 = vadd.f32 %v2105_v22, %v1150_v60  ;;  %v1019_v22 = vmul.f32 %v2163_v52, %v1002_v23 }
 0x70a   : > { %1520 = vmatpush.xpose.msk.msra.mxu0 %vm367_vm0, %v1157_v54  ;;  %v1171_v36 = vpop.permute.xlu2 %1170  ;;  %v1181_v46 = vpop.permute.xlu1 %1180  ;;  %v1255_v54 = vadd.f32 %v1241_v62, %v1239_v2 }
 0x70b   : > { %v972_v6 = vpop.permute.xlu0 %971  ;;  %v1240_v42 = vmul.f32 %v1619_v26, %v1171_v36 }
 0x70c   : > { %v1013_v10 = vmul.f32 %v1616_v9, %v972_v6 }
 0x70e   : > { %1521 = vmatpush.xpose.msk.msra.mxu0 %vm367_vm0, %v1156_v8  ;;  %v1027_v21 = vadd.f32 %v1025_v11, %v1013_v10  ;;  %v1238_v8 = vmul.f32 %v1620_v7, %v1161_v27 }
 0x710   : > { %v1029_v49 = vadd.f32 %v1027_v21, %v1015_v1  ;;  %v1254_v11 = vadd.f32 %v1240_v42, %v1238_v8  ;;  %v1622_v1 = vld [vmem:[%s1848_s25 + $0x30] sm:$0xff] }
 0x711   : > { %1522 = vmatmul.msk.f32.vlgmr.msra.gmra.mxu0 %vm367_vm0, %v1039_v15 }
 0x712   : > { %v1186_v39 = vpop.permute.xlu2 %1185 }
 0x713   : > { %v992_v19 = vpop.permute.xlu0 %991  ;;  %v1243_v3 = vmul.f32 %v2173_v0, %v1186_v39 }
 0x714   : > { %v1017_v14 = vmul.f32 %v2146_v13, %v992_v19 }
 0x715   : > { %v1257_v59 = vadd.f32 %v1255_v54, %v1243_v3 }
 0x716   : > { %v1031_v17 = vadd.f32 %v1029_v49, %v1017_v14 }
 0x718   : > { %v1033_v29 = vadd.f32 %v1031_v17, %v1019_v22 }
 0x71a   : > { %v1040_v32 = vadd.f32 %v1037_v56, %v1033_v29  ;;  %v1196_v41 = vpop.permute.xlu2 %1195 }
 0x71b   : > { %v1191_v48 = vpop.permute.xlu0 %1190  ;;  %v1245_v4 = vmul.f32 %v2180_v5, %v1196_v41  ;;  %v1621_v5 = vld [vmem:[%s1848_s25 + $0x20] sm:$0xff]  ;;  %s1460_s25 = sshll.u32 %s1844_s12, 4 }
 0x71c   : > { %1523 = vmatmul.msk.f32.gmra.mxu0 %vm367_vm0, %v1040_v32  ;;  %v1242_v21 = vmul.f32 %v1621_v5, %v1181_v46  ;;  %v1244_v23 = vmul.f32 %v1622_v1, %v1191_v48  ;;  %s244_s11 = scalar_lea.vmem [#allocation5], %s1460_s25 }
 0x71d   : > { %v1259_v56 = vadd.f32 %v1257_v59, %v1245_v4  ;;  %s1376_s13 = sshll.u32 %s244_s11, 4  ;;  %s1377_s13 = int_to_ptr.vmem [resolvable:$true] %s1376_s13 }
 0x71e   : > { %v1256_v14 = vadd.f32 %v1254_v11, %v1242_v21 }
 0x720   : > { %v1258_v32 = vadd.f32 %v1256_v14, %v1244_v23 }
 0x722   : > { %v1206_v47 = vpop.permute.xlu2 %1205 }
 0x723   : > { %v1211_v55 = vpop.permute.xlu0 %1210  ;;  %v1247_v24 = vmul.f32 %v1616_v9, %v1206_v47 }
 0x725   : > { %v1261_v0 = vadd.f32 %v1259_v56, %v1247_v24 }
 0x72a   : > { %v1201_v53 = vpop.permute.xlu2 %1200 }
 0x72b   : > { %v1246_v49 = vmul.f32 %v2155_v45, %v1201_v53 }
 0x732   : > { %v1226_v57 = vpop.permute.xlu2 %1225 }
 0x733   : > { %v1251_v19 = vmul.f32 %v2146_v13, %v1226_v57 }
 0x73a   : > { %v1236_v6 = vpop.permute.xlu2 %1235 }
 0x73b   : > { %v1253_v22 = vmul.f32 %v2163_v52, %v1236_v6 }
 0x78e   : > { %v1304_v12 = vpop.f32.mrf.mxu0 }
 0x78f   : > { %v1310_v30 = vsel %vm367_vm0, %v1304_v12, -inf }
 0x790   : > { %1311 = vmax.xlane.f32.xlu1 %v1310_v30  ;;  %v1271_v30 = vpop.permute.xlu2 %1270 }
 0x799   : > { %v1307_v33 = vpop.f32.mrf.mxu0 }
 0x79a   : > { %v1313_v35 = vsel %vm367_vm0, %v1307_v33, -inf }
 0x79b   : > { %1314 = vmax.xlane.f32.xlu0 %v1313_v35 }
 0x7a9   : > { %1215 = vperm.xlu1 %1590, %v2111_v16  }
 0x7af   : > { %1220 = vperm.xlu0 %1588, %v2113_v31  }
 0x7b7   : > { %1230 = vperm.xlu0 %1588, %v2121_v43  }
 0x803   : > { %v1312_v50 = vpop.xlane.xlu1 %1311 }
 0x804   : > { %v1316_v18 = vsub.f32 %v1304_v12, %v1312_v50 }
 0x806   : > { %v1318_v16 = vmul.f32 1.442695, %v1316_v18 }
 0x808   : > { %1599 = vpow2.f32 %v1318_v16 }
 0x80e   : > { %v1600_v31 = vpop.eup %1599  ;;  %v1315_v43 = vpop.xlane.xlu0 %1314 }
 0x80f   : > { %v1317_v38 = vsub.f32 %v1307_v33, %v1315_v43  ;;  %v1322_v58 = vsel %vm367_vm0, %v1600_v31, 0.0  ;;  %v1260_v33 = vadd.f32 %v1258_v32, %v1246_v49 }
 0x810   : > { %1323 = vadd.xlane.f32.xlu1 %v1322_v58 }
 0x811   : > { %v1320_v60 = vmul.f32 1.442695, %v1317_v38 }
 0x813   : > { %1601 = vpow2.f32 %v1320_v60 }
 0x819   : > { %v1602_v44 = vpop.eup %1601 }
 0x81a   : > { %v1325_v10 = vsel %vm367_vm0, %v1602_v44, 0.0 }
 0x81b   : > { %v1216_v40 = vpop.permute.xlu1 %1215  ;;  %1326 = vadd.xlane.f32.xlu0 %v1325_v10 }
 0x81c   : > { %v1249_v15 = vmul.f32 %v2135_v28, %v1216_v40  ;;  %v1248_v28 = vmul.f32 %v2142_v34, %v1211_v55 }
 0x81e   : > { %v1263_v9 = vadd.f32 %v1261_v0, %v1249_v15  ;;  %v1262_v25 = vadd.f32 %v1260_v33, %v1248_v28 }
 0x820   : > { %v1265_v17 = vadd.f32 %v1263_v9, %v1251_v19 }
 0x821   : > { %v1221_v29 = vpop.permute.xlu0 %1220 }
 0x822   : > { %v1267_v12 = vadd.f32 %v1265_v17, %v1253_v22  ;;  %v1250_v37 = vmul.f32 %v2151_v20, %v1221_v29 }
 0x824   : > { %v1274_v35 = vadd.f32 %v1271_v30, %v1267_v12  ;;  %v1264_v27 = vadd.f32 %v1262_v25, %v1250_v37 }
 0x826   : > { %1352 = vmatpush.msrb.mxu0 %v1274_v35 }
 0x829   : > { %v1231_v13 = vpop.permute.xlu0 %1230 }
 0x82a   : > { %v1252_v45 = vmul.f32 %v2159_v51, %v1231_v13 }
 0x82c   : > { %v1266_v36 = vadd.f32 %v1264_v27, %v1252_v45 }
 0x82e   : > { %v1273_v52 = vadd.f32 %v1271_v30, %v1266_v36 }
 0x830   : > { %1353 = vmatpush.msrb.mxu0 %v1273_v52 }
 0x883   : > { %v1324_v39 = vpop.xlane.xlu1 %1323 }
 0x884   : > { %1603 = vrcp.f32 %v1324_v39 }
 0x88a   : > { %v1604_v41 = vpop.eup %1603 }
 0x88b   : > { %v1330_v46 = vmul.f32 %v1604_v41, %v1600_v31 }
 0x88d   : > { %1524 = vmatmul.msk.f32.vlgmr.msrb.gmra.mxu0 %vm367_vm0, %v1330_v46 }
 0x88e   : > { %v1327_v34 = vpop.xlane.xlu0 %1326 }
 0x88f   : > { %1605 = vrcp.f32 %v1327_v34 }
 0x895   : > { %v1606_v20 = vpop.eup %1605 }
 0x896   : > { %v1331_v47 = vmul.f32 %v1606_v20, %v1602_v44 }
 0x898   : > { %1525 = vmatmul.msk.f32.gmra.mxu0 %vm367_vm0, %v1331_v47 }
 0x90a   : > { %v1355_v48 = vpop.f32.mrf.mxu0 }
 0x90b   : > { %v1356_v51 = vadd.f32 %v1355_v48, %v1273_v52 }
 0x90d   : > { %1361 = vst.msk [vmem:[%s244_s11] sm:$0xff] %vm367_vm0, %v1356_v51 }
 0x915   : > { %v1358_v50 = vpop.f32.mrf.mxu0 }
 0x916   : > { %v1359_v18 = vadd.f32 %v1358_v50, %v1274_v35 }
 0x918   : > { %1362 = vst.msk [vmem:[%s244_s11 + $0x8] sm:$0xff] %vm367_vm0, %v1359_v18 }
 0x919   : > { %1680 = shalt.err (!%p1677_p4)
}
 0x91a   : > { %s1726_s12 = smov 128   ;;  %s1727_s25 = smov 8  }
 0x91b   : > { %1537 = dma.vmem_to_hbm [thread:$0]  (%p1808_p11), %s1377_s13, 256, %s1379_s15, %s1364_s16, %s1726_s12, %s1726_s12, %s1727_s25  }
 0x91c PF: > { %s1393_s7 = sand.u32 1, %s1707_s18   ;;  %p2263_p7 = scmp.ge.s32.totalorder %s1719_s21, 2 }
 0x91d   : > { %s1394_s11 = scalar_lea.sflag [#allocation4], %s1393_s7 }
 0x91e   : > { %p1544_p5 = pnand %p2263_p7, %p1812_p12 }
 0x920   : > { %p1545_p8 = pneg %p1544_p5 }
 0x922   : > { %1702 = dma.done.wait (%p1545_p8), %s1394_s11, 256  }
 0x923   : > { %1704 = vsyncadd (%p1545_p8), %s1394_s11, 4294967040  ;;  %p18_p10 = scmp.ge.s32.totalorder %s1783_s24, 4   ;;  %s2264_s18 = smov %s1711_s19 }
 0x924   : > { %s2265_s19 = smov %s1715_s20  ;;  %s2266_s20 = smov %s1795_s27 }
 0x925   : > { %s2267_s21 = smov %s1783_s24  ;;  %20 = sbr.rel (!%p18_p10) target bundleno = 5 (0x5), region = 85 }
 0x92a   :  { %1400 = vsyncpa [#allocation3], 1 }
 0x92b   :  { %1402 = vsyncpa [#allocation3 + $0x1], 1 }
 0x92c   :  { %1403 = vsyncpa [#allocation4], 1 }
 0x92d   :  { %1405 = vsyncpa [#allocation4 + $0x1], 1 }

</bundles_post_ra>
